<compile_context>
chip_gen: v7x
topology: tpu7x:2x2x1
jax: 0.10.0
libtpu: 0.0.40
codegen_flags: <defaults>
</compile_context>

<pallas_src>
import math
import jax
import jax.numpy as jnp
from jax import lax
from jax.experimental import pallas as pl
from jax.experimental.pallas import tpu as pltpu

# ----------------------------- model config ---------------------------------
B = 2             # batch (number of sentences)
S = 8             # padded sequence length
H = 32            # hidden size (self.embedding_length)
NUM_HEADS = 4
HEAD_DIM = H // NUM_HEADS
FFN = 4 * H       # intermediate size
NUM_LAYERS = 2
VOCAB = 128
TYPE_VOCAB = 2
MAX_POS = 16
LN_EPS = 1e-12    # BERT LayerNorm eps
CLS_POSITION = 0  # bert-base-cased puts [CLS] first


# ------------------------------ Pallas kernel --------------------------------
def _layer_norm(x, g, b):
    mu = jnp.mean(x, axis=-1, keepdims=True)
    var = jnp.mean((x - mu) ** 2, axis=-1, keepdims=True)
    return (x - mu) * jax.lax.rsqrt(var + LN_EPS) * g + b


def encoder_kernel(x_ref, bias_ref,
                   wqkv_ref, bqkv_ref, wo_ref, vecs_ref,
                   w1_ref, b1_ref, w2_ref,
                   o_ref):
    """Grid = (batch,).  The full NUM_LAYERS encoder stack runs in-kernel over
    VMEM-resident stacked weights; only the CLS row is written out."""
    x0 = x_ref[0]                        # [S, H] f32 embeddings for this sentence
    attn_bias = bias_ref[0]              # [1, S] additive key mask (0 / -1e9)

    def layer_body(l, x):
        wqkv = wqkv_ref[l]               # [H, 3H]  bf16  (q|k|v, scale in q)
        bqkv = bqkv_ref[l]               # [1, 3H]  f32
        wo   = wo_ref[l]                 # [H, H]   bf16
        vecs = vecs_ref[l]               # [6, H]   f32
        w1   = w1_ref[l]                 # [H, FFN] bf16
        b1   = b1_ref[l]                 # [1, FFN] f32
        w2   = w2_ref[l]                 # [FFN, H] bf16

        # Packed (1,H) params: rows = bo, ln1_g, ln1_b, b2, ln2_g, ln2_b
        bo, g1, be1 = vecs[0:1, :], vecs[1:2, :], vecs[2:3, :]
        b2, g2, be2 = vecs[3:4, :], vecs[4:5, :], vecs[5:6, :]

        # --- fused Q/K/V projection: one [S,32]@[32,96] bf16 MXU matmul -------
        qkv = jnp.dot(x.astype(jnp.bfloat16), wqkv,
                      preferred_element_type=jnp.float32) + bqkv     # [S, 3H]

        # --- per-head attention (HD=8 contractions are intrinsic) -------------
        ctx_parts = []
        for h in range(NUM_HEADS):
            lo = h * HEAD_DIM
            qh = qkv[:, lo:lo + HEAD_DIM]                # [S, HD] (scale folded)
            kh = qkv[:, H + lo:H + lo + HEAD_DIM]        # [S, HD]
            vh = qkv[:, 2 * H + lo:2 * H + lo + HEAD_DIM]
            s = lax.dot_general(qh, kh, (((1,), (1,)), ((), ())),
                                preferred_element_type=jnp.float32)  # [S, S]
            s = s + attn_bias
            s = s - jnp.max(s, axis=-1, keepdims=True)
            p = jnp.exp(s)
            p = p * pl.reciprocal(jnp.sum(p, axis=-1, keepdims=True), approx=True)
            ctx_parts.append(jnp.dot(p, vh, preferred_element_type=jnp.float32))
        ctx = jnp.concatenate(ctx_parts, axis=-1)                    # [S, H]

        # --- output projection: single K=32 matmul -----------------------------
        attn_out = jnp.dot(ctx.astype(jnp.bfloat16), wo,
                           preferred_element_type=jnp.float32) + bo  # [S, H]
        x1 = _layer_norm(x + attn_out, g1, be1)

        # --- feed-forward -------------------------------------------------------
        hmid = jnp.dot(x1.astype(jnp.bfloat16), w1,
                       preferred_element_type=jnp.float32) + b1      # [S, FFN]
        # TODO(synk): HF BERT uses exact (erf) GELU; tanh approximation used
        # for robust TPU lowering.
        hmid = 0.5 * hmid * (1.0 + jnp.tanh(0.7978845608028654 *
                                            (hmid + 0.044715 * hmid * hmid * hmid)))
        ffn_out = jnp.dot(hmid.astype(jnp.bfloat16), w2,
                          preferred_element_type=jnp.float32) + b2   # [S, H]
        return _layer_norm(x1 + ffn_out, g2, be2)

    x_final = lax.fori_loop(0, NUM_LAYERS, layer_body, x0, unroll=True)

    # CLS row only (cls_position == 0 for bert-base-cased).
    o_ref[0] = x_final[CLS_POSITION:CLS_POSITION + 1, :]


def bert_encoder_cls(x, attn_bias, packed):
    """Run all encoder layers in one fused pallas_call and return the CLS row.
    x: [B,S,H] f32, attn_bias: [B,1,S] f32, packed: layer-stacked weights."""
    Bn, Sn, Hn = x.shape

    weight_names = ("wqkv", "bqkv", "wo", "vecs", "w1", "b1", "w2")
    weights = [packed[k] for k in weight_names]

    act_spec = pl.BlockSpec((1, Sn, Hn), lambda b: (b, 0, 0))
    bias_spec = pl.BlockSpec((1, 1, Sn), lambda b: (b, 0, 0))
    # Full-array weight blocks with a constant index_map: DMA'd to VMEM once,
    # resident for every grid step (no per-batch re-streaming).
    w_specs = [pl.BlockSpec(w.shape, lambda b, _n=w.ndim: (0,) * _n)
               for w in weights]

    return pl.pallas_call(
        encoder_kernel,
        out_shape=jax.ShapeDtypeStruct((Bn, 1, Hn), jnp.float32),
        grid=(Bn,),
        in_specs=[act_spec, bias_spec] + w_specs,
        out_specs=pl.BlockSpec((1, 1, Hn), lambda b: (b, 0, 0)),
        compiler_params=pltpu.CompilerParams(
            dimension_semantics=("parallel",)),   # v7x: one sentence per TC
    )(x, attn_bias, *weights)


# --------------------------- deterministic params ----------------------------
def init_model_params(key):
    ks = iter(jax.random.split(key, 4 + NUM_LAYERS * 6))

    def nrm(k, shape):
        return (0.02 * jax.random.normal(k, shape)).astype(jnp.float32)

    emb = {
        "word": nrm(next(ks), (VOCAB, H)),
        "pos": nrm(next(ks), (MAX_POS, H)),
        "type": nrm(next(ks), (TYPE_VOCAB, H)),
        "ln_g": jnp.ones((1, H), jnp.float32),
        "ln_b": jnp.zeros((1, H), jnp.float32),
    }

    layers = []
    for _ in range(NUM_LAYERS):
        layers.append(dict(
            wq=nrm(next(ks), (H, H)), bq=jnp.zeros((H,), jnp.float32),
            wk=nrm(next(ks), (H, H)), bk=jnp.zeros((H,), jnp.float32),
            wv=nrm(next(ks), (H, H)), bv=jnp.zeros((H,), jnp.float32),
            wo=nrm(next(ks), (H, H)), bo=jnp.zeros((H,), jnp.float32),
            ln1_g=jnp.ones((H,), jnp.float32), ln1_b=jnp.zeros((H,), jnp.float32),
            w1=nrm(next(ks), (H, FFN)), b1=jnp.zeros((FFN,), jnp.float32),
            w2=nrm(next(ks), (FFN, H)), b2=jnp.zeros((H,), jnp.float32),
            ln2_g=jnp.ones((H,), jnp.float32), ln2_b=jnp.zeros((H,), jnp.float32),
        ))
    return emb, layers


def pack_layer_params(layers):
    """Stack per-layer params on a leading layer axis in the layouts the kernel
    consumes: 2-D fused [H,3H] QKV (1/sqrt(HEAD_DIM) folded into q), plain
    [H,H]/[H,FFN]/[FFN,H] matmul weights in bf16, small vectors packed into one
    f32 [6,H] array.  (x @ W convention: HF [out,in] weights would need .T.)"""
    scale = 1.0 / math.sqrt(HEAD_DIM)

    wqkv, bqkv, wo, vecs, w1, b1, w2 = [], [], [], [], [], [], []
    for p in layers:
        assert p["wq"].shape == (H, H) and p["w1"].shape == (H, FFN)
        wqkv.append(jnp.concatenate([p["wq"] * scale, p["wk"], p["wv"]],
                                    axis=1))                          # [H, 3H]
        bqkv.append(jnp.concatenate([p["bq"] * scale, p["bk"], p["bv"]]
                                    ).reshape(1, 3 * H))              # [1, 3H]
        wo.append(p["wo"])                                            # [H, H]
        vecs.append(jnp.stack([p["bo"], p["ln1_g"], p["ln1_b"],
                               p["b2"], p["ln2_g"], p["ln2_b"]], axis=0))  # [6,H]
        w1.append(p["w1"])                                            # [H, FFN]
        b1.append(p["b1"].reshape(1, FFN))                            # [1, FFN]
        w2.append(p["w2"])                                            # [FFN, H]

    return {
        "wqkv": jnp.stack(wqkv).astype(jnp.bfloat16),
        "bqkv": jnp.stack(bqkv).astype(jnp.float32),
        "wo":   jnp.stack(wo).astype(jnp.bfloat16),
        "vecs": jnp.stack(vecs).astype(jnp.float32),
        "w1":   jnp.stack(w1).astype(jnp.bfloat16),
        "b1":   jnp.stack(b1).astype(jnp.float32),
        "w2":   jnp.stack(w2).astype(jnp.bfloat16),
    }


# ------------------------------ forward pass ---------------------------------
def language_model_forward(input_ids, token_type_ids, attention_mask, emb, packed):
    """Equivalent of LanguageModel.forward after tokenization (eval mode)."""
    Bn, Sn = input_ids.shape
    # Embedding lookup + LayerNorm (glue, plain JAX — gather has no tidy Pallas
    # form at this size).
    x = (emb["word"][input_ids]
         + emb["pos"][:Sn][None, :, :]
         + emb["type"][token_type_ids])
    mu = jnp.mean(x, axis=-1, keepdims=True)
    var = jnp.mean((x - mu) ** 2, axis=-1, keepdims=True)
    x = (x - mu) * jax.lax.rsqrt(var + LN_EPS) * emb["ln_g"] + emb["ln_b"]
    x = x.astype(jnp.float32)

    # Extended additive attention mask, BERT-style: (1 - mask) * -1e9.
    # (Fully-masked keys get uniform-attention behavior like HF; CLS output is
    # unaffected since position 0 is always a real token.)
    attn_bias = ((1.0 - attention_mask.astype(jnp.float32)) * -1e9)[:, None, :]

    # Entire encoder stack + CLS extraction: ONE fused Pallas kernel.
    cls = bert_encoder_cls(x, attn_bias, packed)      # [B, 1, H]
    return cls[:, 0, :]                               # [B, H]


# ---------------------------------- main --------------------------------------
if __name__ == "__main__":
    root = jax.random.PRNGKey(0)
    k_param, k_ids = jax.random.split(root)

    emb, layers = init_model_params(k_param)
    packed = pack_layer_params(layers)

    # Synthetic "tokenized" batch: 2 sentences, padded to S=8, second shorter.
    input_ids = jax.random.randint(k_ids, (B, S), 1, VOCAB, dtype=jnp.int32)
    attention_mask = jnp.array([[1, 1, 1, 1, 1, 1, 1, 1],
                                [1, 1, 1, 1, 1, 0, 0, 0]], dtype=jnp.int32)
    input_ids = input_ids * attention_mask          # pad id = 0
    token_type_ids = jnp.zeros((B, S), dtype=jnp.int32)

    fwd = jax.jit(language_model_forward)
    cls = fwd(input_ids, token_type_ids, attention_mask, emb, packed)
    cls = jax.block_until_ready(cls)
    assert cls.shape == (B, H) and cls.dtype == jnp.float32
    assert bool(jnp.all(jnp.isfinite(cls)))
    print("KERNEL_OK")
</pallas_src>

<mosaic_0001>
module attributes {stable_mosaic.version = 11 : i64} {
  func.func @encoder_kernel(%arg0: i32, %arg1: memref<1x8x32xf32, #tpu.memory_space<vmem>>, %arg2: memref<1x1x8xf32, #tpu.memory_space<vmem>>, %arg3: memref<2x32x96xbf16, #tpu.memory_space<vmem>>, %arg4: memref<2x1x96xf32, #tpu.memory_space<vmem>>, %arg5: memref<2x32x32xbf16, #tpu.memory_space<vmem>>, %arg6: memref<2x6x32xf32, #tpu.memory_space<vmem>>, %arg7: memref<2x32x128xbf16, #tpu.memory_space<vmem>>, %arg8: memref<2x1x128xf32, #tpu.memory_space<vmem>>, %arg9: memref<2x128x32xbf16, #tpu.memory_space<vmem>>, %arg10: memref<1x1x32xf32, #tpu.memory_space<vmem>>) attributes {dimension_semantics = [#tpu.dimension_semantics<parallel>], iteration_bounds = array<i64: 2>, scalar_prefetch = 0 : i64, scratch_operands = 0 : i64, tpu.core_type = #tpu.core_type<tc>, window_params = [{transform_indices = @transform_0, window_bounds = array<i64: 1, 8, 32>}, {transform_indices = @transform_1, window_bounds = array<i64: 1, 1, 8>}, {pipeline_mode = #tpu.pipeline_mode<synchronous>, transform_indices = @transform_2, window_bounds = array<i64: 2, 32, 96>}, {pipeline_mode = #tpu.pipeline_mode<synchronous>, transform_indices = @transform_3, window_bounds = array<i64: 2, 1, 96>}, {pipeline_mode = #tpu.pipeline_mode<synchronous>, transform_indices = @transform_4, window_bounds = array<i64: 2, 32, 32>}, {pipeline_mode = #tpu.pipeline_mode<synchronous>, transform_indices = @transform_5, window_bounds = array<i64: 2, 6, 32>}, {pipeline_mode = #tpu.pipeline_mode<synchronous>, transform_indices = @transform_6, window_bounds = array<i64: 2, 32, 128>}, {pipeline_mode = #tpu.pipeline_mode<synchronous>, transform_indices = @transform_7, window_bounds = array<i64: 2, 1, 128>}, {pipeline_mode = #tpu.pipeline_mode<synchronous>, transform_indices = @transform_8, window_bounds = array<i64: 2, 128, 32>}, {transform_indices = @transform_9, window_bounds = array<i64: 1, 1, 32>}]} {
    %c0 = arith.constant 0 : index
    %c0_0 = arith.constant 0 : index
    %c0_1 = arith.constant 0 : index
    %0 = vector.load %arg1[%c0, %c0_0, %c0_1] : memref<1x8x32xf32, #tpu.memory_space<vmem>>, vector<1x8x32xf32>
    %1 = vector.shape_cast %0 : vector<1x8x32xf32> to vector<8x32xf32>
    %c0_2 = arith.constant 0 : index
    %c0_3 = arith.constant 0 : index
    %c0_4 = arith.constant 0 : index
    %2 = vector.load %arg2[%c0_2, %c0_3, %c0_4] : memref<1x1x8xf32, #tpu.memory_space<vmem>>, vector<1x1x8xf32>
    %3 = vector.shape_cast %2 : vector<1x1x8xf32> to vector<1x8xf32>
    %c0_i32 = arith.constant 0 : i32
    %4 = arith.index_cast %c0_i32 : i32 to index
    %c0_5 = arith.constant 0 : index
    %c0_6 = arith.constant 0 : index
    %5 = vector.load %arg3[%4, %c0_5, %c0_6] : memref<2x32x96xbf16, #tpu.memory_space<vmem>>, vector<1x32x96xbf16>
    %6 = vector.shape_cast %5 : vector<1x32x96xbf16> to vector<32x96xbf16>
    %7 = arith.index_cast %c0_i32 : i32 to index
    %c0_7 = arith.constant 0 : index
    %c0_8 = arith.constant 0 : index
    %8 = vector.load %arg4[%7, %c0_7, %c0_8] : memref<2x1x96xf32, #tpu.memory_space<vmem>>, vector<1x1x96xf32>
    %9 = vector.shape_cast %8 : vector<1x1x96xf32> to vector<1x96xf32>
    %10 = arith.index_cast %c0_i32 : i32 to index
    %c0_9 = arith.constant 0 : index
    %c0_10 = arith.constant 0 : index
    %11 = vector.load %arg5[%10, %c0_9, %c0_10] : memref<2x32x32xbf16, #tpu.memory_space<vmem>>, vector<1x32x32xbf16>
    %12 = vector.shape_cast %11 : vector<1x32x32xbf16> to vector<32x32xbf16>
    %13 = arith.index_cast %c0_i32 : i32 to index
    %c0_11 = arith.constant 0 : index
    %c0_12 = arith.constant 0 : index
    %14 = vector.load %arg6[%13, %c0_11, %c0_12] : memref<2x6x32xf32, #tpu.memory_space<vmem>>, vector<1x6x32xf32>
    %15 = vector.shape_cast %14 : vector<1x6x32xf32> to vector<6x32xf32>
    %16 = arith.index_cast %c0_i32 : i32 to index
    %c0_13 = arith.constant 0 : index
    %c0_14 = arith.constant 0 : index
    %17 = vector.load %arg7[%16, %c0_13, %c0_14] : memref<2x32x128xbf16, #tpu.memory_space<vmem>>, vector<1x32x128xbf16>
    %18 = vector.shape_cast %17 : vector<1x32x128xbf16> to vector<32x128xbf16>
    %19 = arith.index_cast %c0_i32 : i32 to index
    %c0_15 = arith.constant 0 : index
    %c0_16 = arith.constant 0 : index
    %20 = vector.load %arg8[%19, %c0_15, %c0_16] : memref<2x1x128xf32, #tpu.memory_space<vmem>>, vector<1x1x128xf32>
    %21 = vector.shape_cast %20 : vector<1x1x128xf32> to vector<1x128xf32>
    %22 = arith.index_cast %c0_i32 : i32 to index
    %c0_17 = arith.constant 0 : index
    %c0_18 = arith.constant 0 : index
    %23 = vector.load %arg9[%22, %c0_17, %c0_18] : memref<2x128x32xbf16, #tpu.memory_space<vmem>>, vector<1x128x32xbf16>
    %24 = vector.shape_cast %23 : vector<1x128x32xbf16> to vector<128x32xbf16>
    %25 = vector.extract_strided_slice %15 {offsets = [0, 0], sizes = [1, 32], strides = [1, 1]} : vector<6x32xf32> to vector<1x32xf32>
    %26 = vector.extract_strided_slice %15 {offsets = [1, 0], sizes = [1, 32], strides = [1, 1]} : vector<6x32xf32> to vector<1x32xf32>
    %27 = vector.extract_strided_slice %15 {offsets = [2, 0], sizes = [1, 32], strides = [1, 1]} : vector<6x32xf32> to vector<1x32xf32>
    %28 = vector.extract_strided_slice %15 {offsets = [3, 0], sizes = [1, 32], strides = [1, 1]} : vector<6x32xf32> to vector<1x32xf32>
    %29 = vector.extract_strided_slice %15 {offsets = [4, 0], sizes = [1, 32], strides = [1, 1]} : vector<6x32xf32> to vector<1x32xf32>
    %30 = vector.extract_strided_slice %15 {offsets = [5, 0], sizes = [1, 32], strides = [1, 1]} : vector<6x32xf32> to vector<1x32xf32>
    %31 = arith.truncf %1 : vector<8x32xf32> to vector<8x32xbf16>
    %cst = arith.constant dense<0.000000e+00> : vector<8x96xf32>
    %32 = tpu.matmul %31, %6, %cst {dimension_numbers = #tpu.dot_dimension_numbers<[1], [0], [0], [1], [0, 0, 1, 1], [], []>} : vector<8x32xbf16>, vector<32x96xbf16>, vector<8x96xf32> -> vector<8x96xf32>
    %33 = vector.broadcast %9 : vector<1x96xf32> to vector<8x96xf32>
    %34 = arith.addf %32, %33 : vector<8x96xf32>
    %35 = vector.extract_strided_slice %34 {offsets = [0, 0], sizes = [8, 8], strides = [1, 1]} : vector<8x96xf32> to vector<8x8xf32>
    %36 = vector.extract_strided_slice %34 {offsets = [0, 32], sizes = [8, 8], strides = [1, 1]} : vector<8x96xf32> to vector<8x8xf32>
    %37 = vector.extract_strided_slice %34 {offsets = [0, 64], sizes = [8, 8], strides = [1, 1]} : vector<8x96xf32> to vector<8x8xf32>
    %cst_19 = arith.constant dense<0.000000e+00> : vector<8x8xf32>
    %38 = tpu.matmul %35, %36, %cst_19 {dimension_numbers = #tpu.dot_dimension_numbers<[1], [1], [0], [0], [0, 0, 1, 0], [], []>} : vector<8x8xf32>, vector<8x8xf32>, vector<8x8xf32> -> vector<8x8xf32>
    %39 = vector.broadcast %3 : vector<1x8xf32> to vector<8x8xf32>
    %40 = arith.addf %38, %39 : vector<8x8xf32>
    %cst_20 = arith.constant dense<0xFF800000> : vector<8xf32>
    %41 = vector.multi_reduction <maximumf>, %40, %cst_20 [1] : vector<8x8xf32> to vector<8xf32>
    %42 = vector.shape_cast %41 : vector<8xf32> to vector<8x1xf32>
    %43 = vector.broadcast %42 : vector<8x1xf32> to vector<8x8xf32>
    %44 = arith.subf %40, %43 : vector<8x8xf32>
    %45 = math.exp %44 : vector<8x8xf32>
    %cst_21 = arith.constant dense<0.000000e+00> : vector<8xf32>
    %46 = vector.multi_reduction <add>, %45, %cst_21 [1] : vector<8x8xf32> to vector<8xf32>
    %47 = vector.shape_cast %46 : vector<8xf32> to vector<8x1xf32>
    %48 = tpu.reciprocal %47 {approx = true} : vector<8x1xf32> -> vector<8x1xf32>
    %49 = vector.broadcast %48 : vector<8x1xf32> to vector<8x8xf32>
    %50 = arith.mulf %45, %49 : vector<8x8xf32>
    %cst_22 = arith.constant dense<0.000000e+00> : vector<8x8xf32>
    %51 = tpu.matmul %50, %37, %cst_22 {dimension_numbers = #tpu.dot_dimension_numbers<[1], [0], [0], [1], [0, 0, 1, 1], [], []>} : vector<8x8xf32>, vector<8x8xf32>, vector<8x8xf32> -> vector<8x8xf32>
    %52 = vector.extract_strided_slice %34 {offsets = [0, 8], sizes = [8, 8], strides = [1, 1]} : vector<8x96xf32> to vector<8x8xf32>
    %53 = vector.extract_strided_slice %34 {offsets = [0, 40], sizes = [8, 8], strides = [1, 1]} : vector<8x96xf32> to vector<8x8xf32>
    %54 = vector.extract_strided_slice %34 {offsets = [0, 72], sizes = [8, 8], strides = [1, 1]} : vector<8x96xf32> to vector<8x8xf32>
    %cst_23 = arith.constant dense<0.000000e+00> : vector<8x8xf32>
    %55 = tpu.matmul %52, %53, %cst_23 {dimension_numbers = #tpu.dot_dimension_numbers<[1], [1], [0], [0], [0, 0, 1, 0], [], []>} : vector<8x8xf32>, vector<8x8xf32>, vector<8x8xf32> -> vector<8x8xf32>
    %56 = vector.broadcast %3 : vector<1x8xf32> to vector<8x8xf32>
    %57 = arith.addf %55, %56 : vector<8x8xf32>
    %cst_24 = arith.constant dense<0xFF800000> : vector<8xf32>
    %58 = vector.multi_reduction <maximumf>, %57, %cst_24 [1] : vector<8x8xf32> to vector<8xf32>
    %59 = vector.shape_cast %58 : vector<8xf32> to vector<8x1xf32>
    %60 = vector.broadcast %59 : vector<8x1xf32> to vector<8x8xf32>
    %61 = arith.subf %57, %60 : vector<8x8xf32>
    %62 = math.exp %61 : vector<8x8xf32>
    %cst_25 = arith.constant dense<0.000000e+00> : vector<8xf32>
    %63 = vector.multi_reduction <add>, %62, %cst_25 [1] : vector<8x8xf32> to vector<8xf32>
    %64 = vector.shape_cast %63 : vector<8xf32> to vector<8x1xf32>
    %65 = tpu.reciprocal %64 {approx = true} : vector<8x1xf32> -> vector<8x1xf32>
    %66 = vector.broadcast %65 : vector<8x1xf32> to vector<8x8xf32>
    %67 = arith.mulf %62, %66 : vector<8x8xf32>
    %cst_26 = arith.constant dense<0.000000e+00> : vector<8x8xf32>
    %68 = tpu.matmul %67, %54, %cst_26 {dimension_numbers = #tpu.dot_dimension_numbers<[1], [0], [0], [1], [0, 0, 1, 1], [], []>} : vector<8x8xf32>, vector<8x8xf32>, vector<8x8xf32> -> vector<8x8xf32>
    %69 = vector.extract_strided_slice %34 {offsets = [0, 16], sizes = [8, 8], strides = [1, 1]} : vector<8x96xf32> to vector<8x8xf32>
    %70 = vector.extract_strided_slice %34 {offsets = [0, 48], sizes = [8, 8], strides = [1, 1]} : vector<8x96xf32> to vector<8x8xf32>
    %71 = vector.extract_strided_slice %34 {offsets = [0, 80], sizes = [8, 8], strides = [1, 1]} : vector<8x96xf32> to vector<8x8xf32>
    %cst_27 = arith.constant dense<0.000000e+00> : vector<8x8xf32>
    %72 = tpu.matmul %69, %70, %cst_27 {dimension_numbers = #tpu.dot_dimension_numbers<[1], [1], [0], [0], [0, 0, 1, 0], [], []>} : vector<8x8xf32>, vector<8x8xf32>, vector<8x8xf32> -> vector<8x8xf32>
    %73 = vector.broadcast %3 : vector<1x8xf32> to vector<8x8xf32>
    %74 = arith.addf %72, %73 : vector<8x8xf32>
    %cst_28 = arith.constant dense<0xFF800000> : vector<8xf32>
    %75 = vector.multi_reduction <maximumf>, %74, %cst_28 [1] : vector<8x8xf32> to vector<8xf32>
    %76 = vector.shape_cast %75 : vector<8xf32> to vector<8x1xf32>
    %77 = vector.broadcast %76 : vector<8x1xf32> to vector<8x8xf32>
    %78 = arith.subf %74, %77 : vector<8x8xf32>
    %79 = math.exp %78 : vector<8x8xf32>
    %cst_29 = arith.constant dense<0.000000e+00> : vector<8xf32>
    %80 = vector.multi_reduction <add>, %79, %cst_29 [1] : vector<8x8xf32> to vector<8xf32>
    %81 = vector.shape_cast %80 : vector<8xf32> to vector<8x1xf32>
    %82 = tpu.reciprocal %81 {approx = true} : vector<8x1xf32> -> vector<8x1xf32>
    %83 = vector.broadcast %82 : vector<8x1xf32> to vector<8x8xf32>
    %84 = arith.mulf %79, %83 : vector<8x8xf32>
    %cst_30 = arith.constant dense<0.000000e+00> : vector<8x8xf32>
    %85 = tpu.matmul %84, %71, %cst_30 {dimension_numbers = #tpu.dot_dimension_numbers<[1], [0], [0], [1], [0, 0, 1, 1], [], []>} : vector<8x8xf32>, vector<8x8xf32>, vector<8x8xf32> -> vector<8x8xf32>
    %86 = vector.extract_strided_slice %34 {offsets = [0, 24], sizes = [8, 8], strides = [1, 1]} : vector<8x96xf32> to vector<8x8xf32>
    %87 = vector.extract_strided_slice %34 {offsets = [0, 56], sizes = [8, 8], strides = [1, 1]} : vector<8x96xf32> to vector<8x8xf32>
    %88 = vector.extract_strided_slice %34 {offsets = [0, 88], sizes = [8, 8], strides = [1, 1]} : vector<8x96xf32> to vector<8x8xf32>
    %cst_31 = arith.constant dense<0.000000e+00> : vector<8x8xf32>
    %89 = tpu.matmul %86, %87, %cst_31 {dimension_numbers = #tpu.dot_dimension_numbers<[1], [1], [0], [0], [0, 0, 1, 0], [], []>} : vector<8x8xf32>, vector<8x8xf32>, vector<8x8xf32> -> vector<8x8xf32>
    %90 = vector.broadcast %3 : vector<1x8xf32> to vector<8x8xf32>
    %91 = arith.addf %89, %90 : vector<8x8xf32>
    %cst_32 = arith.constant dense<0xFF800000> : vector<8xf32>
    %92 = vector.multi_reduction <maximumf>, %91, %cst_32 [1] : vector<8x8xf32> to vector<8xf32>
    %93 = vector.shape_cast %92 : vector<8xf32> to vector<8x1xf32>
    %94 = vector.broadcast %93 : vector<8x1xf32> to vector<8x8xf32>
    %95 = arith.subf %91, %94 : vector<8x8xf32>
    %96 = math.exp %95 : vector<8x8xf32>
    %cst_33 = arith.constant dense<0.000000e+00> : vector<8xf32>
    %97 = vector.multi_reduction <add>, %96, %cst_33 [1] : vector<8x8xf32> to vector<8xf32>
    %98 = vector.shape_cast %97 : vector<8xf32> to vector<8x1xf32>
    %99 = tpu.reciprocal %98 {approx = true} : vector<8x1xf32> -> vector<8x1xf32>
    %100 = vector.broadcast %99 : vector<8x1xf32> to vector<8x8xf32>
    %101 = arith.mulf %96, %100 : vector<8x8xf32>
    %cst_34 = arith.constant dense<0.000000e+00> : vector<8x8xf32>
    %102 = tpu.matmul %101, %88, %cst_34 {dimension_numbers = #tpu.dot_dimension_numbers<[1], [0], [0], [1], [0, 0, 1, 1], [], []>} : vector<8x8xf32>, vector<8x8xf32>, vector<8x8xf32> -> vector<8x8xf32>
    %103 = tpu.concatenate %51, %68, %85, %102 in 1 : vector<8x8xf32>, vector<8x8xf32>, vector<8x8xf32>, vector<8x8xf32> -> vector<8x32xf32>
    %104 = arith.truncf %103 : vector<8x32xf32> to vector<8x32xbf16>
    %cst_35 = arith.constant dense<0.000000e+00> : vector<8x32xf32>
    %105 = tpu.matmul %104, %12, %cst_35 {dimension_numbers = #tpu.dot_dimension_numbers<[1], [0], [0], [1], [0, 0, 1, 1], [], []>} : vector<8x32xbf16>, vector<32x32xbf16>, vector<8x32xf32> -> vector<8x32xf32>
    %106 = vector.broadcast %25 : vector<1x32xf32> to vector<8x32xf32>
    %107 = arith.addf %105, %106 : vector<8x32xf32>
    %108 = arith.addf %1, %107 : vector<8x32xf32>
    %cst_36 = arith.constant dense<0.000000e+00> : vector<8xf32>
    %109 = vector.multi_reduction <add>, %108, %cst_36 [1] : vector<8x32xf32> to vector<8xf32>
    %110 = vector.shape_cast %109 : vector<8xf32> to vector<8x1xf32>
    %cst_37 = arith.constant 3.200000e+01 : f32
    %111 = vector.broadcast %cst_37 : f32 to vector<8x1xf32>
    %112 = arith.divf %110, %111 : vector<8x1xf32>
    %113 = vector.broadcast %112 : vector<8x1xf32> to vector<8x32xf32>
    %114 = arith.subf %108, %113 : vector<8x32xf32>
    %115 = arith.mulf %114, %114 : vector<8x32xf32>
    %cst_38 = arith.constant dense<0.000000e+00> : vector<8xf32>
    %116 = vector.multi_reduction <add>, %115, %cst_38 [1] : vector<8x32xf32> to vector<8xf32>
    %117 = vector.shape_cast %116 : vector<8xf32> to vector<8x1xf32>
    %cst_39 = arith.constant 3.200000e+01 : f32
    %118 = vector.broadcast %cst_39 : f32 to vector<8x1xf32>
    %119 = arith.divf %117, %118 : vector<8x1xf32>
    %120 = vector.broadcast %112 : vector<8x1xf32> to vector<8x32xf32>
    %121 = arith.subf %108, %120 : vector<8x32xf32>
    %cst_40 = arith.constant 9.99999996E-13 : f32
    %122 = vector.broadcast %cst_40 : f32 to vector<8x1xf32>
    %123 = arith.addf %119, %122 : vector<8x1xf32>
    %124 = math.rsqrt %123 : vector<8x1xf32>
    %125 = vector.broadcast %124 : vector<8x1xf32> to vector<8x32xf32>
    %126 = arith.mulf %121, %125 : vector<8x32xf32>
    %127 = vector.broadcast %26 : vector<1x32xf32> to vector<8x32xf32>
    %128 = arith.mulf %126, %127 : vector<8x32xf32>
    %129 = vector.broadcast %27 : vector<1x32xf32> to vector<8x32xf32>
    %130 = arith.addf %128, %129 : vector<8x32xf32>
    %131 = arith.truncf %130 : vector<8x32xf32> to vector<8x32xbf16>
    %cst_41 = arith.constant dense<0.000000e+00> : vector<8x128xf32>
    %132 = tpu.matmul %131, %18, %cst_41 {dimension_numbers = #tpu.dot_dimension_numbers<[1], [0], [0], [1], [0, 0, 1, 1], [], []>} : vector<8x32xbf16>, vector<32x128xbf16>, vector<8x128xf32> -> vector<8x128xf32>
    %133 = vector.broadcast %21 : vector<1x128xf32> to vector<8x128xf32>
    %134 = arith.addf %132, %133 : vector<8x128xf32>
    %cst_42 = arith.constant 5.000000e-01 : f32
    %135 = vector.broadcast %cst_42 : f32 to vector<8x128xf32>
    %136 = arith.mulf %135, %134 : vector<8x128xf32>
    %cst_43 = arith.constant 4.471500e-02 : f32
    %137 = vector.broadcast %cst_43 : f32 to vector<8x128xf32>
    %138 = arith.mulf %137, %134 : vector<8x128xf32>
    %139 = arith.mulf %138, %134 : vector<8x128xf32>
    %140 = arith.mulf %139, %134 : vector<8x128xf32>
    %141 = arith.addf %134, %140 : vector<8x128xf32>
    %cst_44 = arith.constant 0.797884583 : f32
    %142 = vector.broadcast %cst_44 : f32 to vector<8x128xf32>
    %143 = arith.mulf %142, %141 : vector<8x128xf32>
    %144 = math.tanh %143 : vector<8x128xf32>
    %cst_45 = arith.constant 1.000000e+00 : f32
    %145 = vector.broadcast %cst_45 : f32 to vector<8x128xf32>
    %146 = arith.addf %145, %144 : vector<8x128xf32>
    %147 = arith.mulf %136, %146 : vector<8x128xf32>
    %148 = arith.truncf %147 : vector<8x128xf32> to vector<8x128xbf16>
    %cst_46 = arith.constant dense<0.000000e+00> : vector<8x32xf32>
    %149 = tpu.matmul %148, %24, %cst_46 {dimension_numbers = #tpu.dot_dimension_numbers<[1], [0], [0], [1], [0, 0, 1, 1], [], []>} : vector<8x128xbf16>, vector<128x32xbf16>, vector<8x32xf32> -> vector<8x32xf32>
    %150 = vector.broadcast %28 : vector<1x32xf32> to vector<8x32xf32>
    %151 = arith.addf %149, %150 : vector<8x32xf32>
    %152 = arith.addf %130, %151 : vector<8x32xf32>
    %cst_47 = arith.constant dense<0.000000e+00> : vector<8xf32>
    %153 = vector.multi_reduction <add>, %152, %cst_47 [1] : vector<8x32xf32> to vector<8xf32>
    %154 = vector.shape_cast %153 : vector<8xf32> to vector<8x1xf32>
    %cst_48 = arith.constant 3.200000e+01 : f32
    %155 = vector.broadcast %cst_48 : f32 to vector<8x1xf32>
    %156 = arith.divf %154, %155 : vector<8x1xf32>
    %157 = vector.broadcast %156 : vector<8x1xf32> to vector<8x32xf32>
    %158 = arith.subf %152, %157 : vector<8x32xf32>
    %159 = arith.mulf %158, %158 : vector<8x32xf32>
    %cst_49 = arith.constant dense<0.000000e+00> : vector<8xf32>
    %160 = vector.multi_reduction <add>, %159, %cst_49 [1] : vector<8x32xf32> to vector<8xf32>
    %161 = vector.shape_cast %160 : vector<8xf32> to vector<8x1xf32>
    %cst_50 = arith.constant 3.200000e+01 : f32
    %162 = vector.broadcast %cst_50 : f32 to vector<8x1xf32>
    %163 = arith.divf %161, %162 : vector<8x1xf32>
    %164 = vector.broadcast %156 : vector<8x1xf32> to vector<8x32xf32>
    %165 = arith.subf %152, %164 : vector<8x32xf32>
    %cst_51 = arith.constant 9.99999996E-13 : f32
    %166 = vector.broadcast %cst_51 : f32 to vector<8x1xf32>
    %167 = arith.addf %163, %166 : vector<8x1xf32>
    %168 = math.rsqrt %167 : vector<8x1xf32>
    %169 = vector.broadcast %168 : vector<8x1xf32> to vector<8x32xf32>
    %170 = arith.mulf %165, %169 : vector<8x32xf32>
    %171 = vector.broadcast %29 : vector<1x32xf32> to vector<8x32xf32>
    %172 = arith.mulf %170, %171 : vector<8x32xf32>
    %173 = vector.broadcast %30 : vector<1x32xf32> to vector<8x32xf32>
    %174 = arith.addf %172, %173 : vector<8x32xf32>
    %c1_i32 = arith.constant 1 : i32
    %175 = arith.index_cast %c1_i32 : i32 to index
    %c0_52 = arith.constant 0 : index
    %c0_53 = arith.constant 0 : index
    %176 = vector.load %arg3[%175, %c0_52, %c0_53] : memref<2x32x96xbf16, #tpu.memory_space<vmem>>, vector<1x32x96xbf16>
    %177 = vector.shape_cast %176 : vector<1x32x96xbf16> to vector<32x96xbf16>
    %178 = arith.index_cast %c1_i32 : i32 to index
    %c0_54 = arith.constant 0 : index
    %c0_55 = arith.constant 0 : index
    %179 = vector.load %arg4[%178, %c0_54, %c0_55] : memref<2x1x96xf32, #tpu.memory_space<vmem>>, vector<1x1x96xf32>
    %180 = vector.shape_cast %179 : vector<1x1x96xf32> to vector<1x96xf32>
    %181 = arith.index_cast %c1_i32 : i32 to index
    %c0_56 = arith.constant 0 : index
    %c0_57 = arith.constant 0 : index
    %182 = vector.load %arg5[%181, %c0_56, %c0_57] : memref<2x32x32xbf16, #tpu.memory_space<vmem>>, vector<1x32x32xbf16>
    %183 = vector.shape_cast %182 : vector<1x32x32xbf16> to vector<32x32xbf16>
    %184 = arith.index_cast %c1_i32 : i32 to index
    %c0_58 = arith.constant 0 : index
    %c0_59 = arith.constant 0 : index
    %185 = vector.load %arg6[%184, %c0_58, %c0_59] : memref<2x6x32xf32, #tpu.memory_space<vmem>>, vector<1x6x32xf32>
    %186 = vector.shape_cast %185 : vector<1x6x32xf32> to vector<6x32xf32>
    %187 = arith.index_cast %c1_i32 : i32 to index
    %c0_60 = arith.constant 0 : index
    %c0_61 = arith.constant 0 : index
    %188 = vector.load %arg7[%187, %c0_60, %c0_61] : memref<2x32x128xbf16, #tpu.memory_space<vmem>>, vector<1x32x128xbf16>
    %189 = vector.shape_cast %188 : vector<1x32x128xbf16> to vector<32x128xbf16>
    %190 = arith.index_cast %c1_i32 : i32 to index
    %c0_62 = arith.constant 0 : index
    %c0_63 = arith.constant 0 : index
    %191 = vector.load %arg8[%190, %c0_62, %c0_63] : memref<2x1x128xf32, #tpu.memory_space<vmem>>, vector<1x1x128xf32>
    %192 = vector.shape_cast %191 : vector<1x1x128xf32> to vector<1x128xf32>
    %193 = arith.index_cast %c1_i32 : i32 to index
    %c0_64 = arith.constant 0 : index
    %c0_65 = arith.constant 0 : index
    %194 = vector.load %arg9[%193, %c0_64, %c0_65] : memref<2x128x32xbf16, #tpu.memory_space<vmem>>, vector<1x128x32xbf16>
    %195 = vector.shape_cast %194 : vector<1x128x32xbf16> to vector<128x32xbf16>
    %196 = vector.extract_strided_slice %186 {offsets = [0, 0], sizes = [1, 32], strides = [1, 1]} : vector<6x32xf32> to vector<1x32xf32>
    %197 = vector.extract_strided_slice %186 {offsets = [1, 0], sizes = [1, 32], strides = [1, 1]} : vector<6x32xf32> to vector<1x32xf32>
    %198 = vector.extract_strided_slice %186 {offsets = [2, 0], sizes = [1, 32], strides = [1, 1]} : vector<6x32xf32> to vector<1x32xf32>
    %199 = vector.extract_strided_slice %186 {offsets = [3, 0], sizes = [1, 32], strides = [1, 1]} : vector<6x32xf32> to vector<1x32xf32>
    %200 = vector.extract_strided_slice %186 {offsets = [4, 0], sizes = [1, 32], strides = [1, 1]} : vector<6x32xf32> to vector<1x32xf32>
    %201 = vector.extract_strided_slice %186 {offsets = [5, 0], sizes = [1, 32], strides = [1, 1]} : vector<6x32xf32> to vector<1x32xf32>
    %202 = arith.truncf %174 : vector<8x32xf32> to vector<8x32xbf16>
    %cst_66 = arith.constant dense<0.000000e+00> : vector<8x96xf32>
    %203 = tpu.matmul %202, %177, %cst_66 {dimension_numbers = #tpu.dot_dimension_numbers<[1], [0], [0], [1], [0, 0, 1, 1], [], []>} : vector<8x32xbf16>, vector<32x96xbf16>, vector<8x96xf32> -> vector<8x96xf32>
    %204 = vector.broadcast %180 : vector<1x96xf32> to vector<8x96xf32>
    %205 = arith.addf %203, %204 : vector<8x96xf32>
    %206 = vector.extract_strided_slice %205 {offsets = [0, 0], sizes = [8, 8], strides = [1, 1]} : vector<8x96xf32> to vector<8x8xf32>
    %207 = vector.extract_strided_slice %205 {offsets = [0, 32], sizes = [8, 8], strides = [1, 1]} : vector<8x96xf32> to vector<8x8xf32>
    %208 = vector.extract_strided_slice %205 {offsets = [0, 64], sizes = [8, 8], strides = [1, 1]} : vector<8x96xf32> to vector<8x8xf32>
    %cst_67 = arith.constant dense<0.000000e+00> : vector<8x8xf32>
    %209 = tpu.matmul %206, %207, %cst_67 {dimension_numbers = #tpu.dot_dimension_numbers<[1], [1], [0], [0], [0, 0, 1, 0], [], []>} : vector<8x8xf32>, vector<8x8xf32>, vector<8x8xf32> -> vector<8x8xf32>
    %210 = vector.broadcast %3 : vector<1x8xf32> to vector<8x8xf32>
    %211 = arith.addf %209, %210 : vector<8x8xf32>
    %cst_68 = arith.constant dense<0xFF800000> : vector<8xf32>
    %212 = vector.multi_reduction <maximumf>, %211, %cst_68 [1] : vector<8x8xf32> to vector<8xf32>
    %213 = vector.shape_cast %212 : vector<8xf32> to vector<8x1xf32>
    %214 = vector.broadcast %213 : vector<8x1xf32> to vector<8x8xf32>
    %215 = arith.subf %211, %214 : vector<8x8xf32>
    %216 = math.exp %215 : vector<8x8xf32>
    %cst_69 = arith.constant dense<0.000000e+00> : vector<8xf32>
    %217 = vector.multi_reduction <add>, %216, %cst_69 [1] : vector<8x8xf32> to vector<8xf32>
    %218 = vector.shape_cast %217 : vector<8xf32> to vector<8x1xf32>
    %219 = tpu.reciprocal %218 {approx = true} : vector<8x1xf32> -> vector<8x1xf32>
    %220 = vector.broadcast %219 : vector<8x1xf32> to vector<8x8xf32>
    %221 = arith.mulf %216, %220 : vector<8x8xf32>
    %cst_70 = arith.constant dense<0.000000e+00> : vector<8x8xf32>
    %222 = tpu.matmul %221, %208, %cst_70 {dimension_numbers = #tpu.dot_dimension_numbers<[1], [0], [0], [1], [0, 0, 1, 1], [], []>} : vector<8x8xf32>, vector<8x8xf32>, vector<8x8xf32> -> vector<8x8xf32>
    %223 = vector.extract_strided_slice %205 {offsets = [0, 8], sizes = [8, 8], strides = [1, 1]} : vector<8x96xf32> to vector<8x8xf32>
    %224 = vector.extract_strided_slice %205 {offsets = [0, 40], sizes = [8, 8], strides = [1, 1]} : vector<8x96xf32> to vector<8x8xf32>
    %225 = vector.extract_strided_slice %205 {offsets = [0, 72], sizes = [8, 8], strides = [1, 1]} : vector<8x96xf32> to vector<8x8xf32>
    %cst_71 = arith.constant dense<0.000000e+00> : vector<8x8xf32>
    %226 = tpu.matmul %223, %224, %cst_71 {dimension_numbers = #tpu.dot_dimension_numbers<[1], [1], [0], [0], [0, 0, 1, 0], [], []>} : vector<8x8xf32>, vector<8x8xf32>, vector<8x8xf32> -> vector<8x8xf32>
    %227 = vector.broadcast %3 : vector<1x8xf32> to vector<8x8xf32>
    %228 = arith.addf %226, %227 : vector<8x8xf32>
    %cst_72 = arith.constant dense<0xFF800000> : vector<8xf32>
    %229 = vector.multi_reduction <maximumf>, %228, %cst_72 [1] : vector<8x8xf32> to vector<8xf32>
    %230 = vector.shape_cast %229 : vector<8xf32> to vector<8x1xf32>
    %231 = vector.broadcast %230 : vector<8x1xf32> to vector<8x8xf32>
    %232 = arith.subf %228, %231 : vector<8x8xf32>
    %233 = math.exp %232 : vector<8x8xf32>
    %cst_73 = arith.constant dense<0.000000e+00> : vector<8xf32>
    %234 = vector.multi_reduction <add>, %233, %cst_73 [1] : vector<8x8xf32> to vector<8xf32>
    %235 = vector.shape_cast %234 : vector<8xf32> to vector<8x1xf32>
    %236 = tpu.reciprocal %235 {approx = true} : vector<8x1xf32> -> vector<8x1xf32>
    %237 = vector.broadcast %236 : vector<8x1xf32> to vector<8x8xf32>
    %238 = arith.mulf %233, %237 : vector<8x8xf32>
    %cst_74 = arith.constant dense<0.000000e+00> : vector<8x8xf32>
    %239 = tpu.matmul %238, %225, %cst_74 {dimension_numbers = #tpu.dot_dimension_numbers<[1], [0], [0], [1], [0, 0, 1, 1], [], []>} : vector<8x8xf32>, vector<8x8xf32>, vector<8x8xf32> -> vector<8x8xf32>
    %240 = vector.extract_strided_slice %205 {offsets = [0, 16], sizes = [8, 8], strides = [1, 1]} : vector<8x96xf32> to vector<8x8xf32>
    %241 = vector.extract_strided_slice %205 {offsets = [0, 48], sizes = [8, 8], strides = [1, 1]} : vector<8x96xf32> to vector<8x8xf32>
    %242 = vector.extract_strided_slice %205 {offsets = [0, 80], sizes = [8, 8], strides = [1, 1]} : vector<8x96xf32> to vector<8x8xf32>
    %cst_75 = arith.constant dense<0.000000e+00> : vector<8x8xf32>
    %243 = tpu.matmul %240, %241, %cst_75 {dimension_numbers = #tpu.dot_dimension_numbers<[1], [1], [0], [0], [0, 0, 1, 0], [], []>} : vector<8x8xf32>, vector<8x8xf32>, vector<8x8xf32> -> vector<8x8xf32>
    %244 = vector.broadcast %3 : vector<1x8xf32> to vector<8x8xf32>
    %245 = arith.addf %243, %244 : vector<8x8xf32>
    %cst_76 = arith.constant dense<0xFF800000> : vector<8xf32>
    %246 = vector.multi_reduction <maximumf>, %245, %cst_76 [1] : vector<8x8xf32> to vector<8xf32>
    %247 = vector.shape_cast %246 : vector<8xf32> to vector<8x1xf32>
    %248 = vector.broadcast %247 : vector<8x1xf32> to vector<8x8xf32>
    %249 = arith.subf %245, %248 : vector<8x8xf32>
    %250 = math.exp %249 : vector<8x8xf32>
    %cst_77 = arith.constant dense<0.000000e+00> : vector<8xf32>
    %251 = vector.multi_reduction <add>, %250, %cst_77 [1] : vector<8x8xf32> to vector<8xf32>
    %252 = vector.shape_cast %251 : vector<8xf32> to vector<8x1xf32>
    %253 = tpu.reciprocal %252 {approx = true} : vector<8x1xf32> -> vector<8x1xf32>
    %254 = vector.broadcast %253 : vector<8x1xf32> to vector<8x8xf32>
    %255 = arith.mulf %250, %254 : vector<8x8xf32>
    %cst_78 = arith.constant dense<0.000000e+00> : vector<8x8xf32>
    %256 = tpu.matmul %255, %242, %cst_78 {dimension_numbers = #tpu.dot_dimension_numbers<[1], [0], [0], [1], [0, 0, 1, 1], [], []>} : vector<8x8xf32>, vector<8x8xf32>, vector<8x8xf32> -> vector<8x8xf32>
    %257 = vector.extract_strided_slice %205 {offsets = [0, 24], sizes = [8, 8], strides = [1, 1]} : vector<8x96xf32> to vector<8x8xf32>
    %258 = vector.extract_strided_slice %205 {offsets = [0, 56], sizes = [8, 8], strides = [1, 1]} : vector<8x96xf32> to vector<8x8xf32>
    %259 = vector.extract_strided_slice %205 {offsets = [0, 88], sizes = [8, 8], strides = [1, 1]} : vector<8x96xf32> to vector<8x8xf32>
    %cst_79 = arith.constant dense<0.000000e+00> : vector<8x8xf32>
    %260 = tpu.matmul %257, %258, %cst_79 {dimension_numbers = #tpu.dot_dimension_numbers<[1], [1], [0], [0], [0, 0, 1, 0], [], []>} : vector<8x8xf32>, vector<8x8xf32>, vector<8x8xf32> -> vector<8x8xf32>
    %261 = vector.broadcast %3 : vector<1x8xf32> to vector<8x8xf32>
    %262 = arith.addf %260, %261 : vector<8x8xf32>
    %cst_80 = arith.constant dense<0xFF800000> : vector<8xf32>
    %263 = vector.multi_reduction <maximumf>, %262, %cst_80 [1] : vector<8x8xf32> to vector<8xf32>
    %264 = vector.shape_cast %263 : vector<8xf32> to vector<8x1xf32>
    %265 = vector.broadcast %264 : vector<8x1xf32> to vector<8x8xf32>
    %266 = arith.subf %262, %265 : vector<8x8xf32>
    %267 = math.exp %266 : vector<8x8xf32>
    %cst_81 = arith.constant dense<0.000000e+00> : vector<8xf32>
    %268 = vector.multi_reduction <add>, %267, %cst_81 [1] : vector<8x8xf32> to vector<8xf32>
    %269 = vector.shape_cast %268 : vector<8xf32> to vector<8x1xf32>
    %270 = tpu.reciprocal %269 {approx = true} : vector<8x1xf32> -> vector<8x1xf32>
    %271 = vector.broadcast %270 : vector<8x1xf32> to vector<8x8xf32>
    %272 = arith.mulf %267, %271 : vector<8x8xf32>
    %cst_82 = arith.constant dense<0.000000e+00> : vector<8x8xf32>
    %273 = tpu.matmul %272, %259, %cst_82 {dimension_numbers = #tpu.dot_dimension_numbers<[1], [0], [0], [1], [0, 0, 1, 1], [], []>} : vector<8x8xf32>, vector<8x8xf32>, vector<8x8xf32> -> vector<8x8xf32>
    %274 = tpu.concatenate %222, %239, %256, %273 in 1 : vector<8x8xf32>, vector<8x8xf32>, vector<8x8xf32>, vector<8x8xf32> -> vector<8x32xf32>
    %275 = arith.truncf %274 : vector<8x32xf32> to vector<8x32xbf16>
    %cst_83 = arith.constant dense<0.000000e+00> : vector<8x32xf32>
    %276 = tpu.matmul %275, %183, %cst_83 {dimension_numbers = #tpu.dot_dimension_numbers<[1], [0], [0], [1], [0, 0, 1, 1], [], []>} : vector<8x32xbf16>, vector<32x32xbf16>, vector<8x32xf32> -> vector<8x32xf32>
    %277 = vector.broadcast %196 : vector<1x32xf32> to vector<8x32xf32>
    %278 = arith.addf %276, %277 : vector<8x32xf32>
    %279 = arith.addf %174, %278 : vector<8x32xf32>
    %cst_84 = arith.constant dense<0.000000e+00> : vector<8xf32>
    %280 = vector.multi_reduction <add>, %279, %cst_84 [1] : vector<8x32xf32> to vector<8xf32>
    %281 = vector.shape_cast %280 : vector<8xf32> to vector<8x1xf32>
    %cst_85 = arith.constant 3.200000e+01 : f32
    %282 = vector.broadcast %cst_85 : f32 to vector<8x1xf32>
    %283 = arith.divf %281, %282 : vector<8x1xf32>
    %284 = vector.broadcast %283 : vector<8x1xf32> to vector<8x32xf32>
    %285 = arith.subf %279, %284 : vector<8x32xf32>
    %286 = arith.mulf %285, %285 : vector<8x32xf32>
    %cst_86 = arith.constant dense<0.000000e+00> : vector<8xf32>
    %287 = vector.multi_reduction <add>, %286, %cst_86 [1] : vector<8x32xf32> to vector<8xf32>
    %288 = vector.shape_cast %287 : vector<8xf32> to vector<8x1xf32>
    %cst_87 = arith.constant 3.200000e+01 : f32
    %289 = vector.broadcast %cst_87 : f32 to vector<8x1xf32>
    %290 = arith.divf %288, %289 : vector<8x1xf32>
    %291 = vector.broadcast %283 : vector<8x1xf32> to vector<8x32xf32>
    %292 = arith.subf %279, %291 : vector<8x32xf32>
    %cst_88 = arith.constant 9.99999996E-13 : f32
    %293 = vector.broadcast %cst_88 : f32 to vector<8x1xf32>
    %294 = arith.addf %290, %293 : vector<8x1xf32>
    %295 = math.rsqrt %294 : vector<8x1xf32>
    %296 = vector.broadcast %295 : vector<8x1xf32> to vector<8x32xf32>
    %297 = arith.mulf %292, %296 : vector<8x32xf32>
    %298 = vector.broadcast %197 : vector<1x32xf32> to vector<8x32xf32>
    %299 = arith.mulf %297, %298 : vector<8x32xf32>
    %300 = vector.broadcast %198 : vector<1x32xf32> to vector<8x32xf32>
    %301 = arith.addf %299, %300 : vector<8x32xf32>
    %302 = arith.truncf %301 : vector<8x32xf32> to vector<8x32xbf16>
    %cst_89 = arith.constant dense<0.000000e+00> : vector<8x128xf32>
    %303 = tpu.matmul %302, %189, %cst_89 {dimension_numbers = #tpu.dot_dimension_numbers<[1], [0], [0], [1], [0, 0, 1, 1], [], []>} : vector<8x32xbf16>, vector<32x128xbf16>, vector<8x128xf32> -> vector<8x128xf32>
    %304 = vector.broadcast %192 : vector<1x128xf32> to vector<8x128xf32>
    %305 = arith.addf %303, %304 : vector<8x128xf32>
    %cst_90 = arith.constant 5.000000e-01 : f32
    %306 = vector.broadcast %cst_90 : f32 to vector<8x128xf32>
    %307 = arith.mulf %306, %305 : vector<8x128xf32>
    %cst_91 = arith.constant 4.471500e-02 : f32
    %308 = vector.broadcast %cst_91 : f32 to vector<8x128xf32>
    %309 = arith.mulf %308, %305 : vector<8x128xf32>
    %310 = arith.mulf %309, %305 : vector<8x128xf32>
    %311 = arith.mulf %310, %305 : vector<8x128xf32>
    %312 = arith.addf %305, %311 : vector<8x128xf32>
    %cst_92 = arith.constant 0.797884583 : f32
    %313 = vector.broadcast %cst_92 : f32 to vector<8x128xf32>
    %314 = arith.mulf %313, %312 : vector<8x128xf32>
    %315 = math.tanh %314 : vector<8x128xf32>
    %cst_93 = arith.constant 1.000000e+00 : f32
    %316 = vector.broadcast %cst_93 : f32 to vector<8x128xf32>
    %317 = arith.addf %316, %315 : vector<8x128xf32>
    %318 = arith.mulf %307, %317 : vector<8x128xf32>
    %319 = arith.truncf %318 : vector<8x128xf32> to vector<8x128xbf16>
    %cst_94 = arith.constant dense<0.000000e+00> : vector<8x32xf32>
    %320 = tpu.matmul %319, %195, %cst_94 {dimension_numbers = #tpu.dot_dimension_numbers<[1], [0], [0], [1], [0, 0, 1, 1], [], []>} : vector<8x128xbf16>, vector<128x32xbf16>, vector<8x32xf32> -> vector<8x32xf32>
    %321 = vector.broadcast %199 : vector<1x32xf32> to vector<8x32xf32>
    %322 = arith.addf %320, %321 : vector<8x32xf32>
    %323 = arith.addf %301, %322 : vector<8x32xf32>
    %cst_95 = arith.constant dense<0.000000e+00> : vector<8xf32>
    %324 = vector.multi_reduction <add>, %323, %cst_95 [1] : vector<8x32xf32> to vector<8xf32>
    %325 = vector.shape_cast %324 : vector<8xf32> to vector<8x1xf32>
    %cst_96 = arith.constant 3.200000e+01 : f32
    %326 = vector.broadcast %cst_96 : f32 to vector<8x1xf32>
    %327 = arith.divf %325, %326 : vector<8x1xf32>
    %328 = vector.broadcast %327 : vector<8x1xf32> to vector<8x32xf32>
    %329 = arith.subf %323, %328 : vector<8x32xf32>
    %330 = arith.mulf %329, %329 : vector<8x32xf32>
    %cst_97 = arith.constant dense<0.000000e+00> : vector<8xf32>
    %331 = vector.multi_reduction <add>, %330, %cst_97 [1] : vector<8x32xf32> to vector<8xf32>
    %332 = vector.shape_cast %331 : vector<8xf32> to vector<8x1xf32>
    %cst_98 = arith.constant 3.200000e+01 : f32
    %333 = vector.broadcast %cst_98 : f32 to vector<8x1xf32>
    %334 = arith.divf %332, %333 : vector<8x1xf32>
    %335 = vector.broadcast %327 : vector<8x1xf32> to vector<8x32xf32>
    %336 = arith.subf %323, %335 : vector<8x32xf32>
    %cst_99 = arith.constant 9.99999996E-13 : f32
    %337 = vector.broadcast %cst_99 : f32 to vector<8x1xf32>
    %338 = arith.addf %334, %337 : vector<8x1xf32>
    %339 = math.rsqrt %338 : vector<8x1xf32>
    %340 = vector.broadcast %339 : vector<8x1xf32> to vector<8x32xf32>
    %341 = arith.mulf %336, %340 : vector<8x32xf32>
    %342 = vector.broadcast %200 : vector<1x32xf32> to vector<8x32xf32>
    %343 = arith.mulf %341, %342 : vector<8x32xf32>
    %344 = vector.broadcast %201 : vector<1x32xf32> to vector<8x32xf32>
    %345 = arith.addf %343, %344 : vector<8x32xf32>
    %c2_i32 = arith.constant 2 : i32
    %346 = vector.extract_strided_slice %345 {offsets = [0, 0], sizes = [1, 32], strides = [1, 1]} : vector<8x32xf32> to vector<1x32xf32>
    %c0_100 = arith.constant 0 : index
    %c0_101 = arith.constant 0 : index
    %c0_102 = arith.constant 0 : index
    %347 = vector.load %arg10[%c0_100, %c0_101, %c0_102] : memref<1x1x32xf32, #tpu.memory_space<vmem>>, vector<1x1x32xf32>
    %348 = vector.shape_cast %347 : vector<1x1x32xf32> to vector<1x32xf32>
    %349 = vector.shape_cast %346 : vector<1x32xf32> to vector<1x1x32xf32>
    tpu.vector_store %arg10[%c0_100, %c0_101, %c0_102], %349 {strides = array<i32>} : memref<1x1x32xf32, #tpu.memory_space<vmem>>, vector<1x1x32xf32>,
    return
  }
  func.func @transform_0(%arg0: i32) -> (i32, i32, i32) {
    %c0_i32 = arith.constant 0 : i32
    %c0_i32_0 = arith.constant 0 : i32
    %c0_i32_1 = arith.constant 0 : i32
    return %arg0, %c0_i32, %c0_i32_0 : i32, i32, i32
  }
  func.func @transform_1(%arg0: i32) -> (i32, i32, i32) {
    %c0_i32 = arith.constant 0 : i32
    %c0_i32_0 = arith.constant 0 : i32
    %c0_i32_1 = arith.constant 0 : i32
    return %arg0, %c0_i32, %c0_i32_0 : i32, i32, i32
  }
  func.func @transform_2(%arg0: i32) -> (i32, i32, i32) {
    %c0_i32 = arith.constant 0 : i32
    %c0_i32_0 = arith.constant 0 : i32
    %c0_i32_1 = arith.constant 0 : i32
    %c0_i32_2 = arith.constant 0 : i32
    return %c0_i32, %c0_i32_0, %c0_i32_1 : i32, i32, i32
  }
  func.func @transform_3(%arg0: i32) -> (i32, i32, i32) {
    %c0_i32 = arith.constant 0 : i32
    %c0_i32_0 = arith.constant 0 : i32
    %c0_i32_1 = arith.constant 0 : i32
    %c0_i32_2 = arith.constant 0 : i32
    return %c0_i32, %c0_i32_0, %c0_i32_1 : i32, i32, i32
  }
  func.func @transform_4(%arg0: i32) -> (i32, i32, i32) {
    %c0_i32 = arith.constant 0 : i32
    %c0_i32_0 = arith.constant 0 : i32
    %c0_i32_1 = arith.constant 0 : i32
    %c0_i32_2 = arith.constant 0 : i32
    return %c0_i32, %c0_i32_0, %c0_i32_1 : i32, i32, i32
  }
  func.func @transform_5(%arg0: i32) -> (i32, i32, i32) {
    %c0_i32 = arith.constant 0 : i32
    %c0_i32_0 = arith.constant 0 : i32
    %c0_i32_1 = arith.constant 0 : i32
    %c0_i32_2 = arith.constant 0 : i32
    return %c0_i32, %c0_i32_0, %c0_i32_1 : i32, i32, i32
  }
  func.func @transform_6(%arg0: i32) -> (i32, i32, i32) {
    %c0_i32 = arith.constant 0 : i32
    %c0_i32_0 = arith.constant 0 : i32
    %c0_i32_1 = arith.constant 0 : i32
    %c0_i32_2 = arith.constant 0 : i32
    return %c0_i32, %c0_i32_0, %c0_i32_1 : i32, i32, i32
  }
  func.func @transform_7(%arg0: i32) -> (i32, i32, i32) {
    %c0_i32 = arith.constant 0 : i32
    %c0_i32_0 = arith.constant 0 : i32
    %c0_i32_1 = arith.constant 0 : i32
    %c0_i32_2 = arith.constant 0 : i32
    return %c0_i32, %c0_i32_0, %c0_i32_1 : i32, i32, i32
  }
  func.func @transform_8(%arg0: i32) -> (i32, i32, i32) {
    %c0_i32 = arith.constant 0 : i32
    %c0_i32_0 = arith.constant 0 : i32
    %c0_i32_1 = arith.constant 0 : i32
    %c0_i32_2 = arith.constant 0 : i32
    return %c0_i32, %c0_i32_0, %c0_i32_1 : i32, i32, i32
  }
  func.func @transform_9(%arg0: i32) -> (i32, i32, i32) {
    %c0_i32 = arith.constant 0 : i32
    %c0_i32_0 = arith.constant 0 : i32
    %c0_i32_1 = arith.constant 0 : i32
    return %arg0, %c0_i32, %c0_i32_0 : i32, i32, i32
  }
}

</mosaic_0001>

<bundles_post_ra>
// kernel: language_model_forward.1
= control target key start
LH: loop header
LB: loop body
LE: loop exit
PB: predicated region body
PF: predicated region fallthrough
CT: control target
= control target key end

     0   :  { %14 = vsyncpa [#allocation3], 0  ;;  %s3606_s0 = inlined_call_operand.vmem [shape: f32[2,8,32], index: 0, kind: input, shape index: {}]   ;;  %s3607_s1 = inlined_call_operand.vmem [shape: f32[2,1,8], index: 1, kind: input, shape index: {}]   ;;  %s3608_s2 = inlined_call_operand.vmem [shape: bf16[2,32,96], index: 2, kind: input, shape index: {}]   ;;  %s3609_s3 = inlined_call_operand.vmem [shape: f32[2,1,96], index: 3, kind: input, shape index: {}]   ;;  %s3610_s4 = inlined_call_operand.vmem [shape: bf16[2,32,32], index: 4, kind: input, shape index: {}]   ;;  %s3611_s5 = inlined_call_operand.vmem [shape: f32[2,6,32], index: 5, kind: input, shape index: {}]   ;;  %s3612_s6 = inlined_call_operand.vmem [shape: bf16[2,32,128], index: 6, kind: input, shape index: {}]   ;;  %s3613_s7 = inlined_call_operand.vmem [shape: f32[2,1,128], index: 7, kind: input, shape index: {}]   ;;  %s3614_s8 = inlined_call_operand.vmem [shape: bf16[2,128,32], index: 8, kind: input, shape index: {}]   ;;  %s3615_s9 = inlined_call_operand.hbm [shape: f32[2,1,32], index: 9, kind: output, shape index: {}]  }
   0x1   :  { %16 = vsyncpa [#allocation3 + $0x1], 0  ;;  %s3115_s30 = smov 0   ;;  %s3117_s10 = smov 0  }
   0x2   :  { %s3119_s11 = smov 0   ;;  %s3121_s12 = smov 0  }
   0x3 LB: > { %s3136_s13 = sadd.s32 4294967295, %s3046_s12   ;;  %s2519_s14 = sadd.s32 4294967294, %s3046_s12   ;;  %s3046_s12 = sphi %s3121_s12, %s3641_s12   ;;  %s3042_s11 = sphi %s3119_s11, %s3640_s11   ;;  %s3038_s10 = sphi %s3117_s10, %s3639_s10   ;;  %s3034_s30 = sphi %s3115_s30, %s3638_s30  }
   0x4   : > { %s3140_s15 = sadd.s32 1, %s3046_s12   ;;  %s228_s16 = sadd.s32 1, %s3042_s11 }
   0x5   : > { %s225_s17 = ssub.s32 %s3046_s12, %s3140_s15  ;;  %p238_p0 = scmp.ne.s32.totalorder %s3042_s11, %s3038_s10 }
   0x6   : > { %p226_p1 = scmp.eq.s32.totalorder %s225_s17, 0  ;;  %p239_p2 = scmp.eq.s32.totalorder %s3136_s13, 1 }
   0x7   : > { %p244_p3 = scmp.ne.s32.totalorder %s3038_s10, %s3034_s30  ;;  %p245_p4 = scmp.eq.s32.totalorder %s2519_s14, 1 }
   0x8   : > { %s3151_s18 = scalar_select %p226_p1, %s3042_s11, %s228_s16  }
   0x9   : > { %p3153_p5 = por %p239_p2, %p238_p0  ;;  %p3157_p6 = por %p245_p4, %p244_p3 }
   0xa   : > { %p2522_p7 = scmp.ge.s32.totalorder %s3046_s12, 1  ;;  %p297_p8 = scmp.lt.s32.totalorder %s3046_s12, 3 }
   0xc   : > { %p298_p9 = pnand %p2522_p7, %p297_p8 }
   0xd   : > { %v2912_v0 = vld [vmem:[%s3608_s2] sm:$0xff] (!%p298_p9)   ;;  %v3048_v1 = vmov (!%p298_p9), 0.0   ;;  %v2913_v2 = vld [vmem:[%s3608_s2 + $0x8] sm:$0xff] (!%p298_p9)   ;;  %vm3049_vm0 = vmmov (!%p298_p9), 0   ;;  %p334_p10 = scmp.lt.s32.totalorder (!%p298_p9), %s3136_s13, 1  ;;  %vm394_vm1 = vcmask (!%p298_p9), 261120  }
   0xe   : > { %301 = sbr.rel (%p298_p9) target bundleno = 7162 (0x1bfa), region = 56  ;;  %2689 = vmatprep.subr.bf16.mxu0 (!%p298_p9), %v3048_v1  ;;  %2697 = vmatprep.subr.mxu1 (!%p298_p9), %v3048_v1  ;;  %v2524_v5 = vld [vmem:[%s3609_s3] ss:$0 sm:$0xff] (!%p298_p9)  ;;  %s3050_s17 = smov (!%p298_p9), 64   ;;  %vm447_vm2 = vcmask (!%p298_p9), 64512   ;;  %vm1117_vm3 = vcmask (!%p298_p9), 130048  }
   0xf   : > { %2690 = vmatpush3.bf16.msra.mxu0 (!%p298_p9), %v2912_v0  ;;  %2693 = vmatprep.mubr.msk.bf16.mxu0 (!%p298_p9), %vm3049_vm0, %v3048_v1  ;;  %s3051_s21 = smov (!%p298_p9), 96   ;;  %s3052_s22 = smov (!%p298_p9), 88   ;;  %vm1119_vm4 = vcmask (!%p298_p9), 195584   ;;  %vm2440_vm5 = vcmask (!%p298_p9), 253952  }
  0x10   : > { %2691 = vmatprep.subr.bf16.mxu0 (!%p298_p9), %v3048_v1  ;;  %2699 = vmatprep.mubr.msk.f32.mxu1 (!%p298_p9), %vm3049_vm0, %v3048_v1  ;;  %s3053_s23 = smov (!%p298_p9), 120   ;;  %s3620_s24 = smov (!%p298_p9), 80  }
  0x11   : > { %s3618_s14 = smov (!%p298_p9), 104   ;;  %s3625_s16 = smov (!%p298_p9), 56  }
  0x12   : > { %s3617_s27 = smov (!%p298_p9), 48  }
  0x13   : > { %2692 = vmatpush3.bf16.msra.mxu0 (!%p298_p9), %v2913_v2 }
  0x14   : > { %2712 = vmatprep.subr.mxu0 (!%p298_p9), %v3048_v1 }
  0x15   : > { %s3178_s25 = scalar_select %p334_p10, %s3136_s13, 1 }
  0x17   : > { %s2523_s26 = sshll.u32 %s3178_s25, 3  ;;  %s340_s28 = scalar_lea.vmem %s3607_s1, %s3178_s25 }
  0x18   : > { %s337_s29 = scalar_lea.vmem %s3606_s0, %s2523_s26  ;;  %v3218_v13 = vld [vmem:[%s340_s28] ss:$0 sm:$0xff]  ;;  %s3624_s25 = smov 112  }
  0x19   : > { %v3185_v3 = vld [vmem:[%s337_s29] sm:$0xff]  ;;  %s3619_s29 = smov 72   ;;  %s3616_s26 = smov 40  }
  0x1a   : > { %v375_v4 = vpack.c.bf16 %v3185_v3, %v3185_v3 }
  0x1c   : > { %2694 = vmatmul.mubr.msk.bf16.vlgmr.msra.gmra.mrb[0].mxu0 %vm394_vm1, %v375_v4 }
  0x1d   : > { %2714 = vmatprep.mubr.msk.f32.mxu0 %vm3049_vm0, %v3048_v1 }
  0xef   : > { %v432_v6 = vpop.f32.mrb[0].mxu0 }
  0xf0   : > { %v3195_v7 = vadd.f32 %v2524_v5, %v432_v6  ;;  %v2695_v8 = vpop.f32.mrb[1].mxu0 }
  0xf1   : > { %v435_v9 = vpop.f32.mrb[2].mxu0 }
  0xf2   : > { %533 = vrot.lane.b32.xlu1 %v3195_v7, %s3050_s17  ;;  %445 = vrot.lane.b32.xlu0 %v3195_v7, %s3051_s21  ;;  %v2696_v10 = vpop.f32.mrb[3].mxu0 }
  0xf6   : > { %611 = vrot.lane.b32.xlu1 %v3195_v7, %s3052_s22 }
  0xfa   : > { %609 = vrot.lane.b32.xlu1 %v3195_v7, %s3053_s23 }
  0xfe   : > { %776 = vrot.lane.b32.xlu1 %v3195_v7, %s3620_s24  ;;  %s3623_s24 = smov 16  }
 0x164   : > { %v446_v11 = vpop.permute.xlu0 %445  ;;  %v534_v12 = vpop.permute.xlu1 %533 }
 0x165   : > { %2698 = vmatpush3.xpose.msk.msra.mxu1 %vm447_vm2, %v446_v11  ;;  %v2914_v11 = vld [vmem:[%s3610_s4] sm:$0xff]  }
 0x166   : > { %2702 = vmatprep.subr.mxu1 %v3048_v1 }
 0x168   : > { %2700 = vmatmul.mubr.msk.f32.vlgmr.msra.gmra.mrb[0].mxu1 %vm447_vm2, %v3195_v7  ;;  %v612_v23 = vpop.permute.xlu1 %611 }
 0x169   : > { %2703 = vmatpush3.msra.mxu1 %v534_v12  ;;  %2704 = vmatprep.mubr.msk.f32.mxu1 %vm3049_vm0, %v3048_v1  ;;  %v2915_v12 = vld [vmem:[%s3610_s4 + $0x8] sm:$0xff]  }
 0x16a   : > { %2707 = vmatprep.subr.mxu1 %v3048_v1 }
 0x16c   : > { %v610_v24 = vpop.permute.xlu1 %609 }
 0x170   : > { %v777_v25 = vpop.permute.xlu1 %776 }
 0x23b   : > { %v518_v14 = vpop.f32.mrb[0].mxu1 }
 0x23c   : > { %v519_v15 = vadd.f32 %v3218_v13, %v518_v14  ;;  %v2701_v16 = vpop.f32.mrb[1].mxu1 }
 0x23e   : > { %v522_v17 = vsel %vm447_vm2, %v519_v15, -inf }
 0x23f   : > { %523 = vmax.xlane.f32.xlu0 %v522_v17 }
 0x255   : > { %941 = vrot.lane.b32.xlu0 %v3195_v7, %s3619_s29  ;;  %s3622_s29 = smov 8  }
 0x2cc   : > { %v524_v18 = vpop.xlane.xlu0 %523 }
 0x2cd   : > { %v525_v19 = vsub.f32 %v519_v15, %v524_v18 }
 0x2cf   : > { %v526_v20 = vmul.f32 1.442695, %v525_v19 }
 0x2d0   : > { %v942_v30 = vpop.permute.xlu0 %941 }
 0x2d1   : > { %2940 = vpow2.f32 %v526_v20 }
 0x2db   : > { %v2941_v21 = vpop.eup %2940 }
 0x2dc   : > { %v528_v22 = vsel %vm447_vm2, %v2941_v21, 0.0 }
 0x2dd   : > { %529 = vadd.xlane.f32.xlu1 %v528_v22 }
 0x2ee   : > { %774 = vrot.lane.b32.xlu1 %v3195_v7, %s3624_s25 }
 0x2f2   : > { %939 = vrot.lane.b32.xlu1 %v3195_v7, %s3618_s14 }
 0x36a   : > { %v530_v26 = vpop.xlane.xlu1 %529 }
 0x36b   : > { %2942 = vrcp.f32 %v530_v26 }
 0x36e   : > { %v775_v29 = vpop.permute.xlu1 %774 }
 0x372   : > { %v940_v31 = vpop.permute.xlu1 %939 }
 0x375   : > { %v2943_v27 = vpop.eup %2942 }
 0x376   : > { %v532_v28 = vmul.f32 %v2943_v27, %v2941_v21  ;;  %v1122_v27 = vlaneseq }
 0x378   : > { %2705 = vmatmul.mubr.msk.f32.vlgmr.msra.gmra.mrb[2].mxu1 %vm447_vm2, %v532_v28  ;;  %v3294_v28 = vshrl.u32 %v1122_v27, 7 }
 0x379   : > { %2708 = vmatpush3.xpose.msk.msra.mxu1 %vm447_vm2, %v612_v23  ;;  %2709 = vmatprep.mubr.msk.f32.mxu1 %vm3049_vm0, %v3048_v1 }
 0x37a   : > { %2717 = vmatprep.subr.mxu1 %v3048_v1 }
 0x37c   : > { %2710 = vmatmul.mubr.msk.f32.vlgmr.msra.gmra.mrb[4].mxu1 %vm447_vm2, %v610_v24 }
 0x37d   : > { %2718 = vmatpush3.xpose.msk.msra.mxu1 %vm447_vm2, %v777_v25  ;;  %2719 = vmatprep.mubr.msk.f32.mxu1 %vm3049_vm0, %v3048_v1 }
 0x37e   : > { %2727 = vmatprep.subr.mxu1 %v3048_v1 }
 0x380   : > { %2720 = vmatmul.mubr.msk.f32.vlgmr.msra.gmra.mrb[6].mxu1 %vm447_vm2, %v775_v29  ;;  %v1124_v29 = vsub.s32 0, %v3294_v28 }
 0x381   : > { %2728 = vmatpush3.xpose.msk.msra.mxu1 %vm447_vm2, %v942_v30  ;;  %2729 = vmatprep.mubr.msk.f32.mxu1 %vm3049_vm0, %v3048_v1  ;;  %v3300_v30 = vld [vmem:[%s3611_s5] sm:$0x3f] }
 0x382   : > { %2753 = vmatprep.subr.bf16.mxu1 %v3048_v1 }
 0x384   : > { %2730 = vmatmul.mubr.msk.f32.vlgmr.msra.gmra.mrb[8].mxu1 %vm447_vm2, %v940_v31  ;;  %v1125_v31 = vrot.slane %v3300_v30, %v1124_v29 }
 0x385   : > { %2769 = vmatprep.mubr.msk.bf16.mxu1 %vm3049_vm0, %v3048_v1 }
 0x44b   : > { %v3247_v32 = vpop.f32.mrb[2].mxu1 }
 0x44c   : > { %v2706_v33 = vpop.f32.mrb[3].mxu1 }
 0x44f   : > { %v683_v34 = vpop.f32.mrb[4].mxu1 }
 0x450   : > { %v684_v35 = vadd.f32 %v3218_v13, %v683_v34  ;;  %v2711_v36 = vpop.f32.mrb[5].mxu1 }
 0x452   : > { %v687_v37 = vsel %vm447_vm2, %v684_v35, -inf }
 0x453   : > { %688 = vmax.xlane.f32.xlu1 %v687_v37  ;;  %v848_v38 = vpop.f32.mrb[6].mxu1 }
 0x454   : > { %v849_v39 = vadd.f32 %v3218_v13, %v848_v38  ;;  %v2721_v40 = vpop.f32.mrb[7].mxu1 }
 0x456   : > { %v852_v41 = vsel %vm447_vm2, %v849_v39, -inf }
 0x457   : > { %853 = vmax.xlane.f32.xlu0 %v852_v41  ;;  %v1013_v42 = vpop.f32.mrb[8].mxu1 }
 0x458   : > { %v1014_v43 = vadd.f32 %v3218_v13, %v1013_v42  ;;  %v2731_v44 = vpop.f32.mrb[9].mxu1 }
 0x459   : > { %v2916_v44 = vld [vmem:[%s3612_s6] sm:$0xff]  }
 0x45a   : > { %v1017_v45 = vsel %vm447_vm2, %v1014_v43, -inf }
 0x45b   : > { %1018 = vmax.xlane.f32.xlu1 %v1017_v45  ;;  %v2917_v45 = vld [vmem:[%s3612_s6 + $0x8] sm:$0xff]  }
 0x46c   : > { %698 = vrot.lane.b32.xlu1 %v3195_v7, %s3625_s16  ;;  %s3632_s16 = smov 104  }
 0x4e0   : > { %v689_v46 = vpop.xlane.xlu1 %688 }
 0x4e1   : > { %v690_v47 = vsub.f32 %v684_v35, %v689_v46 }
 0x4e3   : > { %v691_v48 = vmul.f32 1.442695, %v690_v47 }
 0x4e4   : > { %v854_v49 = vpop.xlane.xlu0 %853 }
 0x4e5   : > { %2944 = vpow2.f32 %v691_v48  ;;  %v855_v50 = vsub.f32 %v849_v39, %v854_v49  ;;  %v1198_v49 = vsub.s32 1, %v3294_v28 }
 0x4e7   : > { %v856_v51 = vmul.f32 1.442695, %v855_v50  ;;  %v1203_v50 = vsub.s32 2, %v3294_v28 }
 0x4e8   : > { %v1019_v52 = vpop.xlane.xlu1 %1018 }
 0x4e9   : > { %2946 = vpow2.f32 %v856_v51  ;;  %v1020_v53 = vsub.f32 %v1014_v43, %v1019_v52  ;;  %v1199_v51 = vrot.slane %v3300_v30, %v1198_v49 }
 0x4eb   : > { %v1021_v54 = vmul.f32 1.442695, %v1020_v53 }
 0x4ec   : > { %v699_v55 = vpop.permute.xlu1 %698 }
 0x4ed   : > { %2948 = vpow2.f32 %v1021_v54  ;;  %2713 = vmatpush3.msra.mxu0 %v699_v55  ;;  %v1204_v54 = vrot.slane %v3300_v30, %v1203_v50 }
 0x4ee   : > { %2722 = vmatprep.subr.mxu0 %v3048_v1 }
 0x4ef   : > { %v2945_v56 = vpop.eup %2944 }
 0x4f0   : > { %v693_v57 = vsel %vm447_vm2, %v2945_v56, 0.0 }
 0x4f1   : > { %694 = vadd.xlane.f32.xlu1 %v693_v57 }
 0x4f3   : > { %v2947_v58 = vpop.eup %2946 }
 0x4f4   : > { %v858_v59 = vsel %vm447_vm2, %v2947_v58, 0.0 }
 0x4f5   : > { %859 = vadd.xlane.f32.xlu1 %v858_v59  ;;  %v2920_v59 = vld [vmem:[%s3614_s8 + $0x10] sm:$0xff]  }
 0x4f7   : > { %v2949_v60 = vpop.eup %2948 }
 0x4f8   : > { %v1023_v61 = vsel %vm447_vm2, %v2949_v60, 0.0 }
 0x4f9   : > { %1024 = vadd.xlane.f32.xlu0 %v1023_v61  ;;  %v2922_v61 = vld [vmem:[%s3614_s8 + $0x20] sm:$0xff]  }
 0x506   : > { %1028 = vrot.lane.b32.xlu1 %v3195_v7, %s3616_s26  ;;  %s3621_s26 = smov 24  }
 0x50f   : > { %863 = vrot.lane.b32.xlu0 %v3195_v7, %s3617_s27  ;;  %s3633_s27 = smov 48  }
 0x57e   : > { %v695_v62 = vpop.xlane.xlu1 %694 }
 0x57f   : > { %2950 = vrcp.f32 %v695_v62  ;;  %v2923_v62 = vld [vmem:[%s3614_s8 + $0x28] sm:$0xff]  }
 0x582   : > { %v860_v63 = vpop.xlane.xlu1 %859 }
 0x583   : > { %2952 = vrcp.f32 %v860_v63  ;;  %v2924_v63 = vld [vmem:[%s3614_s8 + $0x30] sm:$0xff]  }
 0x586   : > { %v1025_v0 = vpop.xlane.xlu0 %1024  ;;  %v1029_v7 = vpop.permute.xlu1 %1028 }
 0x587   : > { %2954 = vrcp.f32 %v1025_v0  ;;  %v2925_v0 = vld [vmem:[%s3614_s8 + $0x38] sm:$0xff]  }
 0x589   : > { %v2951_v2 = vpop.eup %2950 }
 0x58a   : > { %v697_v4 = vmul.f32 %v2951_v2, %v2945_v56  ;;  %v864_v5 = vpop.permute.xlu0 %863  ;;  %v2544_v2 = vld [vmem:[%s3613_s7] ss:$0 sm:$0xff] }
 0x58c   : > { %2715 = vmatmul.mubr.msk.f32.vlgmr.msra.gmra.mrb[4].mxu0 %vm447_vm2, %v697_v4 }
 0x58d   : > { %v2953_v6 = vpop.eup %2952  ;;  %2723 = vmatpush3.msra.mxu0 %v864_v5  ;;  %2724 = vmatprep.mubr.msk.f32.mxu0 %vm3049_vm0, %v3048_v1 }
 0x58e   : > { %v862_v8 = vmul.f32 %v2953_v6, %v2947_v58  ;;  %2732 = vmatprep.subr.mxu0 %v3048_v1  ;;  %v2919_v58 = vld [vmem:[%s3614_s8 + $0x8] sm:$0xff]  }
 0x590   : > { %2725 = vmatmul.mubr.msk.f32.vlgmr.msra.gmra.mrb[6].mxu0 %vm447_vm2, %v862_v8 }
 0x591   : > { %v2955_v9 = vpop.eup %2954  ;;  %2733 = vmatpush3.msra.mxu0 %v1029_v7  ;;  %2734 = vmatprep.mubr.msk.f32.mxu0 %vm3049_vm0, %v3048_v1 }
 0x592   : > { %v1027_v10 = vmul.f32 %v2955_v9, %v2949_v60  ;;  %2737 = vmatprep.subr.bf16.mxu0 %v3048_v1  ;;  %v2921_v60 = vld [vmem:[%s3614_s8 + $0x18] sm:$0xff]  }
 0x594   : > { %2735 = vmatmul.mubr.msk.f32.vlgmr.msra.gmra.mrb[8].mxu0 %vm447_vm2, %v1027_v10 }
 0x595   : > { %2741 = vmatprep.mubr.msk.bf16.mxu0 %vm3049_vm0, %v3048_v1  ;;  %2738 = vmatpush3.bf16.msra.mxu0 %v2914_v11 }
 0x596   : > { %2739 = vmatprep.subr.bf16.mxu0 %v3048_v1 }
 0x599   : > { %2740 = vmatpush3.bf16.msra.mxu0 %v2915_v12 }
 0x59a   : > { %2745 = vmatprep.subr.bf16.mxu0 %v3048_v1 }
 0x65f   : > { %v770_v14 = vpop.f32.mrb[4].mxu0 }
 0x660   : > { %1105 = vrot.lane.b32.xlu1 %v770_v14, %s3622_s29  ;;  %v2716_v15 = vpop.f32.mrb[5].mxu0  ;;  %s3635_s29 = smov 16  }
 0x663   : > { %v935_v16 = vpop.f32.mrb[6].mxu0 }
 0x664   : > { %1109 = vrot.lane.b32.xlu0 %v935_v16, %s3623_s24  ;;  %v2726_v17 = vpop.f32.mrb[7].mxu0  ;;  %s3634_s24 = smov 40  }
 0x667   : > { %v1100_v18 = vpop.f32.mrb[8].mxu0 }
 0x668   : > { %1113 = vrot.lane.b32.xlu1 %v1100_v18, %s3621_s26  ;;  %v2736_v19 = vpop.f32.mrb[9].mxu0  ;;  %s3636_s26 = smov 8  }
 0x6d2   : > { %v1106_v20 = vpop.permute.xlu1 %1105 }
 0x6d3   : > { %v1116_v22 = vsel %vm447_vm2, %v3247_v32, %v1106_v20  ;;  %v1280_v20 = vsub.s32 3, %v3294_v28 }
 0x6d6   : > { %v1110_v21 = vpop.permute.xlu0 %1109 }
 0x6d7   : > { %v1118_v23 = vsel %vm1117_vm3, %v1116_v22, %v1110_v21  ;;  %v1281_v21 = vrot.slane %v3300_v30, %v1280_v20 }
 0x6da   : > { %v1114_v24 = vpop.permute.xlu1 %1113 }
 0x6db   : > { %v1120_v25 = vsel %vm1119_vm4, %v1118_v23, %v1114_v24 }
 0x6dc   : > { %v1121_v26 = vpack.c.bf16 %v1120_v25, %v1120_v25 }
 0x6de   : > { %2742 = vmatmul.mubr.msk.bf16.vlgmr.msra.gmra.mrb[12].mxu0 %vm394_vm1, %v1121_v26 }
 0x6df   : > { %2749 = vmatprep.mubr.msk.bf16.mxu0 %vm3049_vm0, %v3048_v1  ;;  %2746 = vmatpush3.bf16.msra.mxu0 %v2916_v44 }
 0x6e0   : > { %2747 = vmatprep.subr.bf16.mxu0 %v3048_v1 }
 0x6e3   : > { %2748 = vmatpush3.bf16.msra.mxu0 %v2917_v45 }
 0x6e4   : > { %2773 = vmatprep.subr.bf16.mxu0 %v3048_v1 }
 0x7b1   : > { %v1175_v32 = vpop.f32.mrb[12].mxu0 }
 0x7b2   : > { %v1176_v33 = vadd.f32 %v1175_v32, %v1125_v31  ;;  %v2743_v34 = vpop.f32.mrb[13].mxu0 }
 0x7b3   : > { %v1178_v35 = vpop.f32.mrb[14].mxu0 }
 0x7b4   : > { %v2744_v36 = vpop.f32.mrb[15].mxu0  ;;  %v1181_v37 = vadd.f32 %v1176_v33, %v3185_v3  ;;  %v2918_v3 = vld [vmem:[%s3614_s8] sm:$0xff]  }
 0x7b5   : > { %2754 = vmatpush3.bf16.msra.mxu1 %v2918_v3 }
 0x7b6   : > { %v1182_v38 = vsel %vm394_vm1, %v1181_v37, 0.0  ;;  %2755 = vmatprep.subr.bf16.mxu1 %v3048_v1 }
 0x7b7   : > { %1183 = vadd.xlane.f32.xlu0 %v1182_v38  ;;  %v2927_v38 = vld [vmem:[%s3608_s2 + $0x18] sm:$0xff]  }
 0x7b9   : > { %2756 = vmatpush3.bf16.msra.mxu1 %v2919_v58 }
 0x7ba   : > { %2757 = vmatprep.subr.bf16.mxu1 %v3048_v1 }
 0x7bd   : > { %2758 = vmatpush3.bf16.msra.mxu1 %v2920_v59 }
 0x7be   : > { %2759 = vmatprep.subr.bf16.mxu1 %v3048_v1 }
 0x7c1   : > { %2760 = vmatpush3.bf16.msra.mxu1 %v2921_v60 }
 0x7c2   : > { %2761 = vmatprep.subr.bf16.mxu1 %v3048_v1 }
 0x7c5   : > { %2762 = vmatpush3.bf16.msra.mxu1 %v2922_v61 }
 0x7c6   : > { %2763 = vmatprep.subr.bf16.mxu1 %v3048_v1 }
 0x7c9   : > { %2764 = vmatpush3.bf16.msra.mxu1 %v2923_v62 }
 0x7ca   : > { %2765 = vmatprep.subr.bf16.mxu1 %v3048_v1 }
 0x7cd   : > { %2766 = vmatpush3.bf16.msra.mxu1 %v2924_v63 }
 0x7ce   : > { %2767 = vmatprep.subr.bf16.mxu1 %v3048_v1 }
 0x7d1   : > { %2768 = vmatpush3.bf16.msra.mxu1 %v2925_v0 }
 0x7d2   : > { %2821 = vmatprep.subr.bf16.mxu1 %v3048_v1 }
 0x844   : > { %v1184_v39 = vpop.xlane.xlu0 %1183 }
 0x845   : > { %v1186_v40 = vmul.f32 0.03125, %v1184_v39 }
 0x847   : > { %v1187_v41 = vsub.f32 %v1181_v37, %v1186_v40  ;;  %v2926_v37 = vld [vmem:[%s3608_s2 + $0x10] sm:$0xff]  }
 0x849   : > { %v1188_v42 = vmul.f32 %v1187_v41, %v1187_v41 }
 0x84b   : > { %v1189_v43 = vsel %vm394_vm1, %v1188_v42, 0.0  ;;  %v1386_v42 = vsub.s32 4, %v3294_v28 }
 0x84c   : > { %1190 = vadd.xlane.f32.xlu1 %v1189_v43  ;;  %v1391_v43 = vsub.s32 5, %v3294_v28 }
 0x84d   : > { %v1387_v44 = vrot.slane %v3300_v30, %v1386_v42 }
 0x8d9   : > { %v1191_v46 = vpop.xlane.xlu1 %1190 }
 0x8da   : > { %v1192_v47 = vmul.f32 0.03125, %v1191_v46  ;;  %v1392_v46 = vrot.slane %v3300_v30, %v1391_v43 }
 0x8dc   : > { %v1193_v48 = vadd.f32 1e-12, %v1192_v47 }
 0x8de   : > { %2956 = vrsqrt.f32 %v1193_v48 }
 0x8e8   : > { %v2957_v52 = vpop.eup %2956 }
 0x8e9   : > { %v1195_v53 = vmul.f32 %v2957_v52, %v1187_v41  ;;  %v2587_v52 = vld [vmem:[%s3609_s3 + $0x1] ss:$0 sm:$0xff] }
 0x8eb   : > { %v1200_v55 = vmul.f32 %v1199_v51, %v1195_v53 }
 0x8ed   : > { %v1205_v56 = vadd.f32 %v1204_v54, %v1200_v55 }
 0x8ef   : > { %v1206_v57 = vpack.c.bf16 %v1205_v56, %v1205_v56 }
 0x8f1   : > { %2750 = vmatmul.mubr.msk.bf16.vlgmr.msra.gmra.mrb[16].mxu0 %vm394_vm1, %v1206_v57 }
 0x8f2   : > { %2777 = vmatprep.mubr.msk.bf16.mxu0 %vm3049_vm0, %v3048_v1  ;;  %2774 = vmatpush3.bf16.msra.mxu0 %v2926_v37 }
 0x8f3   : > { %2775 = vmatprep.subr.bf16.mxu0 %v3048_v1 }
 0x8f6   : > { %2776 = vmatpush3.bf16.msra.mxu0 %v2927_v38 }
 0x8f7   : > { %2781 = vmatprep.subr.mxu0 %v3048_v1 }
 0x9c4   : > { %v1262_v4 = vpop.f32.mrb[16].mxu0 }
 0x9c5   : > { %v1263_v5 = vadd.f32 %v2544_v2, %v1262_v4  ;;  %v2751_v6 = vpop.f32.mrb[17].mxu0 }
 0x9c6   : > { %v1265_v8 = vpop.f32.mrb[18].mxu0 }
 0x9c7   : > { %v1269_v7 = vmul.f32 0.044715, %v1263_v5  ;;  %v2752_v9 = vpop.f32.mrb[19].mxu0  ;;  %v1268_v16 = vmul.f32 0.5, %v1263_v5 }
 0x9c9   : > { %v1270_v10 = vmul.f32 %v1269_v7, %v1263_v5 }
 0x9cb   : > { %v1271_v11 = vmul.f32 %v1270_v10, %v1263_v5 }
 0x9cd   : > { %v1272_v12 = vadd.f32 %v1271_v11, %v1263_v5 }
 0x9cf   : > { %v1273_v14 = vmul.f32 0.7978846, %v1272_v12 }
 0x9d1   : > { %2958 = vtanh.f32 %v1273_v14 }
 0x9db   : > { %v2959_v15 = vpop.eup %2958 }
 0x9dc   : > { %v1275_v17 = vadd.f32 1.0, %v2959_v15 }
 0x9de   : > { %v1276_v18 = vmul.f32 %v1275_v17, %v1268_v16 }
 0x9e0   : > { %v1277_v19 = vpack.c.bf16 %v1276_v18, %v1276_v18 }
 0x9e2   : > { %2770 = vmatmul.mubr.bf16.vlgmr.msra.gmra.mrb[12].mxu1 %v1277_v19 }
 0x9e3   : > { %2825 = vmatprep.mubr.msk.bf16.mxu1 %vm3049_vm0, %v3048_v1 }
 0xab5   : > { %v1364_v22 = vpop.f32.mrb[12].mxu1 }
 0xab6   : > { %v1365_v23 = vadd.f32 %v1364_v22, %v1281_v21  ;;  %v2771_v24 = vpop.f32.mrb[13].mxu1 }
 0xab7   : > { %v1367_v25 = vpop.f32.mrb[14].mxu1 }
 0xab8   : > { %v2772_v26 = vpop.f32.mrb[15].mxu1  ;;  %v1370_v27 = vadd.f32 %v1365_v23, %v1205_v56 }
 0xaba   : > { %v1371_v31 = vsel %vm394_vm1, %v1370_v27, 0.0 }
 0xabb   : > { %1372 = vadd.xlane.f32.xlu0 %v1371_v31 }
 0xb48   : > { %v1373_v32 = vpop.xlane.xlu0 %1372 }
 0xb49   : > { %v1374_v33 = vmul.f32 0.03125, %v1373_v32 }
 0xb4b   : > { %v1375_v34 = vsub.f32 %v1370_v27, %v1374_v33 }
 0xb4d   : > { %v1376_v35 = vmul.f32 %v1375_v34, %v1375_v34 }
 0xb4f   : > { %v1377_v36 = vsel %vm394_vm1, %v1376_v35, 0.0 }
 0xb50   : > { %1378 = vadd.xlane.f32.xlu0 %v1377_v36 }
 0xbdd   : > { %v1379_v39 = vpop.xlane.xlu0 %1378 }
 0xbde   : > { %v1380_v40 = vmul.f32 0.03125, %v1379_v39 }
 0xbe0   : > { %v1381_v41 = vadd.f32 1e-12, %v1380_v40 }
 0xbe2   : > { %2960 = vrsqrt.f32 %v1381_v41 }
 0xbec   : > { %v2961_v45 = vpop.eup %2960 }
 0xbed   : > { %v1383_v3 = vmul.f32 %v2961_v45, %v1375_v34 }
 0xbef   : > { %v1388_v47 = vmul.f32 %v1387_v44, %v1383_v3 }
 0xbf1   : > { %v3386_v48 = vadd.f32 %v1392_v46, %v1388_v47 }
 0xbf3   : > { %v1432_v51 = vpack.c.bf16 %v3386_v48, %v3386_v48 }
 0xbf5   : > { %2778 = vmatmul.mubr.msk.bf16.vlgmr.msra.gmra.mrb[20].mxu0 %vm394_vm1, %v1432_v51 }
 0xbf6   : > { %2783 = vmatprep.mubr.msk.f32.mxu0 %vm3049_vm0, %v3048_v1 }
 0xcc8   : > { %v1488_v53 = vpop.f32.mrb[20].mxu0 }
 0xcc9   : > { %v3396_v54 = vadd.f32 %v2587_v52, %v1488_v53  ;;  %v2779_v55 = vpop.f32.mrb[21].mxu0 }
 0xcca   : > { %v1491_v30 = vpop.f32.mrb[22].mxu0 }
 0xccb   : > { %1495 = vrot.lane.b32.xlu1 %v3396_v54, %s3051_s21  ;;  %v2780_v56 = vpop.f32.mrb[23].mxu0  ;;  %s3629_s21 = smov 112  }
 0xccf   : > { %1660 = vrot.lane.b32.xlu1 %v3396_v54, %s3052_s22  ;;  %s3630_s22 = smov 80  }
 0xcd3   : > { %1658 = vrot.lane.b32.xlu1 %v3396_v54, %s3053_s23  ;;  %s3631_s23 = smov 72  }
 0xd3d   : > { %v1496_v57 = vpop.permute.xlu1 %1495 }
 0xd3e   : > { %2782 = vmatpush3.xpose.msk.msra.mxu0 %vm447_vm2, %v1496_v57 }
 0xd3f   : > { %2786 = vmatprep.subr.mxu0 %v3048_v1 }
 0xd41   : > { %2784 = vmatmul.mubr.msk.f32.vlgmr.msra.gmra.mrb[10].mxu0 %vm447_vm2, %v3396_v54  ;;  %v1661_v7 = vpop.permute.xlu1 %1660 }
 0xd42   : > { %2788 = vmatprep.mubr.msk.f32.mxu0 %vm3049_vm0, %v3048_v1 }
 0xd45   : > { %v1659_v10 = vpop.permute.xlu1 %1658 }
 0xe14   : > { %v1567_v58 = vpop.f32.mrb[10].mxu0 }
 0xe15   : > { %v1568_v59 = vadd.f32 %v3218_v13, %v1567_v58  ;;  %v2785_v60 = vpop.f32.mrb[11].mxu0 }
 0xe17   : > { %v1571_v61 = vsel %vm447_vm2, %v1568_v59, -inf }
 0xe18   : > { %1572 = vmax.xlane.f32.xlu0 %v1571_v61 }
 0xea5   : > { %v1573_v62 = vpop.xlane.xlu0 %1572 }
 0xea6   : > { %v1574_v63 = vsub.f32 %v1568_v59, %v1573_v62 }
 0xea8   : > { %v1575_v0 = vmul.f32 1.442695, %v1574_v63 }
 0xeaa   : > { %2962 = vpow2.f32 %v1575_v0 }
 0xeb4   : > { %v2963_v2 = vpop.eup %2962 }
 0xeb5   : > { %v1577_v4 = vsel %vm447_vm2, %v2963_v2, 0.0 }
 0xeb6   : > { %1578 = vadd.xlane.f32.xlu0 %v1577_v4 }
 0xecc   : > { %1582 = vrot.lane.b32.xlu0 %v3396_v54, %s3050_s17  ;;  %s3628_s17 = smov 56  }
 0xf43   : > { %v1579_v5 = vpop.xlane.xlu0 %1578 }
 0xf44   : > { %2964 = vrcp.f32 %v1579_v5  ;;  %v2928_v5 = vld [vmem:[%s3610_s4 + $0x10] sm:$0xff]  }
 0xf45   : > { %2822 = vmatpush3.bf16.msra.mxu1 %v2928_v5 }
 0xf46   : > { %2823 = vmatprep.subr.bf16.mxu1 %v3048_v1 }
 0xf47   : > { %v1583_v6 = vpop.permute.xlu0 %1582 }
 0xf48   : > { %2787 = vmatpush3.msra.mxu0 %v1583_v6  ;;  %v2929_v6 = vld [vmem:[%s3610_s4 + $0x18] sm:$0xff]  }
 0xf49   : > { %2791 = vmatprep.subr.mxu0 %v3048_v1  ;;  %2824 = vmatpush3.bf16.msra.mxu1 %v2929_v6 }
 0xf4a   : > { %2837 = vmatprep.subr.bf16.mxu1 %v3048_v1 }
 0xf4e   : > { %v2965_v8 = vpop.eup %2964 }
 0xf4f   : > { %v1581_v9 = vmul.f32 %v2965_v8, %v2963_v2 }
 0xf51   : > { %2789 = vmatmul.mubr.msk.f32.vlgmr.msra.gmra.mrb[24].mxu0 %vm447_vm2, %v1581_v9 }
 0xf52   : > { %2792 = vmatpush3.xpose.msk.msra.mxu0 %vm447_vm2, %v1661_v7  ;;  %2793 = vmatprep.mubr.msk.f32.mxu0 %vm3049_vm0, %v3048_v1 }
 0xf53   : > { %2796 = vmatprep.subr.mxu0 %v3048_v1 }
 0xf55   : > { %2794 = vmatmul.mubr.msk.f32.vlgmr.msra.gmra.mrb[26].mxu0 %vm447_vm2, %v1659_v10 }
 0xf56   : > { %2798 = vmatprep.mubr.msk.f32.mxu0 %vm3049_vm0, %v3048_v1 }
0x1024   : > { %v3424_v11 = vpop.f32.mrb[24].mxu0 }
0x1025   : > { %v2790_v12 = vpop.f32.mrb[25].mxu0 }
0x1028   : > { %v1732_v14 = vpop.f32.mrb[26].mxu0 }
0x1029   : > { %v1733_v15 = vadd.f32 %v3218_v13, %v1732_v14  ;;  %v2795_v16 = vpop.f32.mrb[27].mxu0 }
0x102b   : > { %v1736_v17 = vsel %vm447_vm2, %v1733_v15, -inf }
0x102c   : > { %1737 = vmax.xlane.f32.xlu1 %v1736_v17 }
0x103d   : > { %1747 = vrot.lane.b32.xlu1 %v3396_v54, %s3628_s17 }
0x1041   : > { %1823 = vrot.lane.b32.xlu1 %v3396_v54, %s3629_s21  ;;  %s3637_s21 = smov 24  }
0x10b9   : > { %v1738_v18 = vpop.xlane.xlu1 %1737 }
0x10ba   : > { %v1739_v19 = vsub.f32 %v1733_v15, %v1738_v18  ;;  %v3492_v18 = vld [vmem:[%s3611_s5 + $0x8] sm:$0x3f] }
0x10bb   : > { %v2327_v6 = vrot.slane %v3492_v18, %v1280_v20 }
0x10bc   : > { %v1740_v21 = vmul.f32 1.442695, %v1739_v19 }
0x10bd   : > { %v1748_v22 = vpop.permute.xlu1 %1747 }
0x10be   : > { %2966 = vpow2.f32 %v1740_v21  ;;  %2797 = vmatpush3.msra.mxu0 %v1748_v22 }
0x10bf   : > { %2801 = vmatprep.subr.mxu0 %v3048_v1 }
0x10c1   : > { %v1824_v32 = vpop.permute.xlu1 %1823 }
0x10c8   : > { %v2967_v23 = vpop.eup %2966 }
0x10c9   : > { %v1742_v24 = vsel %vm447_vm2, %v2967_v23, 0.0 }
0x10ca   : > { %1743 = vadd.xlane.f32.xlu0 %v1742_v24 }
0x10e0   : > { %1825 = vrot.lane.b32.xlu0 %v3396_v54, %s3630_s22  ;;  %s332_s22 = sand.u32 1, %s3038_s10  }
0x10e1   : > { %s2443_s28 = scalar_lea.sflag [#allocation3], %s332_s22 }
0x1157   : > { %v1744_v25 = vpop.xlane.xlu0 %1743 }
0x1158   : > { %2968 = vrcp.f32 %v1744_v25 }
0x115b   : > { %v1826_v31 = vpop.permute.xlu0 %1825 }
0x1162   : > { %v2969_v26 = vpop.eup %2968 }
0x1163   : > { %v1746_v27 = vmul.f32 %v2969_v26, %v2967_v23 }
0x1165   : > { %2799 = vmatmul.mubr.msk.f32.vlgmr.msra.gmra.mrb[28].mxu0 %vm447_vm2, %v1746_v27 }
0x1166   : > { %2802 = vmatpush3.xpose.msk.msra.mxu0 %vm447_vm2, %v1826_v31  ;;  %2803 = vmatprep.mubr.msk.f32.mxu0 %vm3049_vm0, %v3048_v1 }
0x1167   : > { %2806 = vmatprep.subr.mxu0 %v3048_v1 }
0x1169   : > { %2804 = vmatmul.mubr.msk.f32.vlgmr.msra.gmra.mrb[30].mxu0 %vm447_vm2, %v1824_v32 }
0x116a   : > { %2808 = vmatprep.mubr.msk.f32.mxu0 %vm3049_vm0, %v3048_v1 }
0x1238   : > { %v1819_v33 = vpop.f32.mrb[28].mxu0 }
0x1239   : > { %v2800_v34 = vpop.f32.mrb[29].mxu0 }
0x123c   : > { %v1897_v35 = vpop.f32.mrb[30].mxu0 }
0x123d   : > { %v1898_v36 = vadd.f32 %v3218_v13, %v1897_v35  ;;  %v2805_v37 = vpop.f32.mrb[31].mxu0  ;;  %v2931_v35 = vld [vmem:[%s3612_s6 + $0x18] sm:$0xff]  }
0x123f   : > { %v1901_v38 = vsel %vm447_vm2, %v1898_v36, -inf }
0x1240   : > { %1902 = vmax.xlane.f32.xlu1 %v1901_v38 }
0x1251   : > { %1990 = vrot.lane.b32.xlu1 %v3396_v54, %s3631_s23  ;;  %s2618_s23 = sshll.u32 %s3136_s13, 4  ;;  %s3064_s13 = smov [#allocation2]  }
0x1252   : > { %s2988_s25 = sshll.u32 %s3064_s13, 4  ;;  %s2989_s25 = int_to_ptr.vmem [resolvable:$false] %s2988_s25 }
0x1253   : > { %s2990_s17 = scalar_lea.vmem %s2989_s25, 32 }
0x1255   : > { %1988 = vrot.lane.b32.xlu1 %v3396_v54, %s3632_s16  ;;  %s333_s16 = scalar_lea.vmem [#allocation2], %s332_s22 }
0x12cd   : > { %v1903_v39 = vpop.xlane.xlu1 %1902 }
0x12ce   : > { %v1904_v40 = vsub.f32 %v1898_v36, %v1903_v39  ;;  %v2245_v39 = vrot.slane %v3492_v18, %v1198_v49  ;;  %v2934_v49 = vld [vmem:[%s3614_s8 + $0x50] sm:$0xff]  }
0x12d0   : > { %v1905_v41 = vmul.f32 1.442695, %v1904_v40 }
0x12d1   : > { %v1991_v51 = vpop.permute.xlu1 %1990 }
0x12d2   : > { %2970 = vpow2.f32 %v1905_v41 }
0x12d5   : > { %v1989_v53 = vpop.permute.xlu1 %1988 }
0x12dc   : > { %v2971_v44 = vpop.eup %2970 }
0x12dd   : > { %v1907_v45 = vsel %vm447_vm2, %v2971_v44, 0.0 }
0x12de   : > { %1908 = vadd.xlane.f32.xlu0 %v1907_v45 }
0x12f4   : > { %1912 = vrot.lane.b32.xlu0 %v3396_v54, %s3633_s27  ;;  %s2455_s27 = sshll.u32 %s333_s16, 4  ;;  %s3566_s27 = int_to_ptr.vmem [resolvable:$true] %s2455_s27 }
0x12f5   : > { %s2984_s14 = scalar_lea.vmem %s3566_s27, 16  ;;  %p2991_p0 = scmp.lt.s32.totalorder %s3566_s27, %s2989_s25 }
0x12f6   : > { %p2985_p11 = scmp.ne.s32.totalorder %s3566_s27, %s2984_s14  ;;  %p2992_p1 = scmp.lt.s32.totalorder %s2990_s17, %s2984_s14 }
0x12f8   : > { %p2986_p12 = pnand %p2985_p11, %p3153_p5  ;;  %p2993_p2 = por %p2992_p1, %p2991_p0 }
0x12fa   : > { %p2987_p13 = pneg %p2986_p12 }
0x12fc   : > { %p2994_p3 = pnand %p2993_p2, %p2987_p13 }
0x136b   : > { %v1909_v3 = vpop.xlane.xlu0 %1908 }
0x136c   : > { %2972 = vrcp.f32 %v1909_v3 }
0x136f   : > { %v1913_v46 = vpop.permute.xlu0 %1912 }
0x1370   : > { %2807 = vmatpush3.msra.mxu0 %v1913_v46 }
0x1371   : > { %2811 = vmatprep.subr.mxu0 %v3048_v1 }
0x1376   : > { %v2973_v47 = vpop.eup %2972 }
0x1377   : > { %v1911_v52 = vmul.f32 %v2973_v47, %v2971_v44  ;;  %v2250_v44 = vrot.slane %v3492_v18, %v1203_v50  ;;  %v2933_v47 = vld [vmem:[%s3614_s8 + $0x48] sm:$0xff]   ;;  %v2935_v50 = vld [vmem:[%s3614_s8 + $0x58] sm:$0xff]  }
0x1379   : > { %2809 = vmatmul.mubr.msk.f32.vlgmr.msra.gmra.mrb[32].mxu0 %vm447_vm2, %v1911_v52  ;;  %v2937_v52 = vld [vmem:[%s3614_s8 + $0x68] sm:$0xff]  }
0x137a   : > { %2812 = vmatpush3.xpose.msk.msra.mxu0 %vm447_vm2, %v1991_v51  ;;  %2813 = vmatprep.mubr.msk.f32.mxu0 %vm3049_vm0, %v3048_v1  ;;  %v2936_v51 = vld [vmem:[%s3614_s8 + $0x60] sm:$0xff]  }
0x137b   : > { %2816 = vmatprep.subr.mxu0 %v3048_v1 }
0x137d   : > { %2814 = vmatmul.mubr.msk.f32.vlgmr.msra.gmra.mrb[34].mxu0 %vm447_vm2, %v1989_v53  ;;  %v2938_v53 = vld [vmem:[%s3614_s8 + $0x70] sm:$0xff]  }
0x137e   : > { %2818 = vmatprep.mubr.msk.f32.mxu0 %vm3049_vm0, %v3048_v1 }
0x144c   : > { %v1984_v55 = vpop.f32.mrb[32].mxu0 }
0x144d   : > { %v2810_v30 = vpop.f32.mrb[33].mxu0 }
0x144e   : > { %v2606_v30 = vld [vmem:[%s3613_s7 + $0x1] ss:$0 sm:$0xff] }
0x1450   : > { %v2062_v56 = vpop.f32.mrb[34].mxu0 }
0x1451   : > { %v2063_v57 = vadd.f32 %v3218_v13, %v2062_v56  ;;  %v2815_v58 = vpop.f32.mrb[35].mxu0 }
0x1453   : > { %v2066_v59 = vsel %vm447_vm2, %v2063_v57, -inf }
0x1454   : > { %2067 = vmax.xlane.f32.xlu0 %v2066_v59 }
0x146a   : > { %2077 = vrot.lane.b32.xlu0 %v3396_v54, %s3634_s24 }
0x146e   : > { %2158 = vrot.lane.b32.xlu0 %v1984_v55, %s3635_s29  ;;  %v2939_v55 = vld [vmem:[%s3614_s8 + $0x78] sm:$0xff]  }
0x14e1   : > { %v2068_v60 = vpop.xlane.xlu0 %2067 }
0x14e2   : > { %v2069_v61 = vsub.f32 %v2063_v57, %v2068_v60 }
0x14e4   : > { %v2070_v62 = vmul.f32 1.442695, %v2069_v61 }
0x14e5   : > { %v2078_v63 = vpop.permute.xlu0 %2077 }
0x14e6   : > { %2974 = vpow2.f32 %v2070_v62  ;;  %2817 = vmatpush3.msra.mxu0 %v2078_v63 }
0x14e7   : > { %2829 = vmatprep.subr.bf16.mxu0 %v3048_v1 }
0x14e9   : > { %v2159_v12 = vpop.permute.xlu0 %2158 }
0x14f0   : > { %v2975_v0 = vpop.eup %2974 }
0x14f1   : > { %v2072_v13 = vsel %vm447_vm2, %v2975_v0, 0.0 }
0x14f2   : > { %2073 = vadd.xlane.f32.xlu1 %v2072_v13 }
0x1503   : > { %2154 = vrot.lane.b32.xlu1 %v1819_v33, %s3636_s26  ;;  %s3564_s26 = scalar_lea.hbm %s3615_s9, %s2618_s23 }
0x157f   : > { %v2074_v2 = vpop.xlane.xlu1 %2073 }
0x1580   : > { %2976 = vrcp.f32 %v2074_v2 }
0x1583   : > { %v2155_v9 = vpop.permute.xlu1 %2154 }
0x1584   : > { %v2165_v10 = vsel %vm447_vm2, %v3424_v11, %v2155_v9  ;;  %v2172_v11 = vrot.slane %v3492_v18, %v1124_v29  ;;  %v2930_v29 = vld [vmem:[%s3612_s6 + $0x10] sm:$0xff]  }
0x1585   : > { %v2166_v14 = vsel %vm1117_vm3, %v2165_v10, %v2159_v12 }
0x158a   : > { %v2977_v4 = vpop.eup %2976 }
0x158b   : > { %v2076_v54 = vmul.f32 %v2977_v4, %v2975_v0 }
0x158d   : > { %2819 = vmatmul.mubr.msk.f32.vlgmr.msra.gmra.mrb[36].mxu0 %vm447_vm2, %v2076_v54 }
0x158e   : > { %2833 = vmatprep.mubr.msk.bf16.mxu0 %vm3049_vm0, %v3048_v1  ;;  %2830 = vmatpush3.bf16.msra.mxu0 %v2930_v29 }
0x158f   : > { %2831 = vmatprep.subr.bf16.mxu0 %v3048_v1 }
0x1592   : > { %2832 = vmatpush3.bf16.msra.mxu0 %v2931_v35 }
0x1660   : > { %v2149_v8 = vpop.f32.mrb[36].mxu0 }
0x1661   : > { %2162 = vrot.lane.b32.xlu1 %v2149_v8, %s3637_s21  ;;  %v2820_v7 = vpop.f32.mrb[37].mxu0 }
0x16d3   : > { %v2163_v15 = vpop.permute.xlu1 %2162 }
0x16d4   : > { %v2167_v16 = vsel %vm1119_vm4, %v2166_v14, %v2163_v15 }
0x16d5   : > { %v2168_v17 = vpack.c.bf16 %v2167_v16, %v2167_v16 }
0x16d7   : > { %2826 = vmatmul.mubr.msk.bf16.vlgmr.msra.gmra.mrb[16].mxu1 %vm394_vm1, %v2168_v17 }
0x16d8   : > { %2853 = vmatprep.mubr.msk.bf16.mxu1 %vm3049_vm0, %v3048_v1 }
0x17aa   : > { %v2222_v19 = vpop.f32.mrb[16].mxu1 }
0x17ab   : > { %v2223_v21 = vadd.f32 %v2222_v19, %v2172_v11  ;;  %v2827_v22 = vpop.f32.mrb[17].mxu1 }
0x17ac   : > { %v2225_v23 = vpop.f32.mrb[18].mxu1 }
0x17ad   : > { %v2828_v24 = vpop.f32.mrb[19].mxu1  ;;  %v2228_v25 = vadd.f32 %v2223_v21, %v3386_v48  ;;  %v2932_v48 = vld [vmem:[%s3614_s8 + $0x40] sm:$0xff]  }
0x17ae   : > { %2838 = vmatpush3.bf16.msra.mxu1 %v2932_v48  ;;  %v2433_v24 = vrot.slane %v3492_v18, %v1386_v42 }
0x17af   : > { %v2229_v26 = vsel %vm394_vm1, %v2228_v25, 0.0  ;;  %2839 = vmatprep.subr.bf16.mxu1 %v3048_v1 }
0x17b0   : > { %2230 = vadd.xlane.f32.xlu0 %v2229_v26 }
0x17b2   : > { %2840 = vmatpush3.bf16.msra.mxu1 %v2933_v47 }
0x17b3   : > { %2841 = vmatprep.subr.bf16.mxu1 %v3048_v1 }
0x17b6   : > { %2842 = vmatpush3.bf16.msra.mxu1 %v2934_v49 }
0x17b7   : > { %2843 = vmatprep.subr.bf16.mxu1 %v3048_v1 }
0x17ba   : > { %2844 = vmatpush3.bf16.msra.mxu1 %v2935_v50 }
0x17bb   : > { %2845 = vmatprep.subr.bf16.mxu1 %v3048_v1 }
0x17be   : > { %2846 = vmatpush3.bf16.msra.mxu1 %v2936_v51 }
0x17bf   : > { %2847 = vmatprep.subr.bf16.mxu1 %v3048_v1 }
0x17c2   : > { %2848 = vmatpush3.bf16.msra.mxu1 %v2937_v52 }
0x17c3   : > { %2849 = vmatprep.subr.bf16.mxu1 %v3048_v1 }
0x17c6   : > { %2850 = vmatpush3.bf16.msra.mxu1 %v2938_v53 }
0x17c7   : > { %2851 = vmatprep.subr.bf16.mxu1 %v3048_v1 }
0x17ca   : > { %2852 = vmatpush3.bf16.msra.mxu1 %v2939_v55 }
0x183d   : > { %v2231_v27 = vpop.xlane.xlu0 %2230 }
0x183e   : > { %v2232_v31 = vmul.f32 0.03125, %v2231_v27  ;;  %v2438_v27 = vrot.slane %v3492_v18, %v1391_v43 }
0x1840   : > { %v2233_v32 = vsub.f32 %v2228_v25, %v2232_v31 }
0x1842   : > { %v2234_v33 = vmul.f32 %v2233_v32, %v2233_v32 }
0x1844   : > { %v2235_v34 = vsel %vm394_vm1, %v2234_v33, 0.0 }
0x1845   : > { %2236 = vadd.xlane.f32.xlu1 %v2235_v34 }
0x18d2   : > { %v2237_v36 = vpop.xlane.xlu1 %2236 }
0x18d3   : > { %v2238_v37 = vmul.f32 0.03125, %v2237_v36 }
0x18d5   : > { %v2239_v38 = vadd.f32 1e-12, %v2238_v37 }
0x18d7   : > { %2978 = vrsqrt.f32 %v2239_v38 }
0x18e1   : > { %v2979_v40 = vpop.eup %2978 }
0x18e2   : > { %v2241_v41 = vmul.f32 %v2979_v40, %v2233_v32 }
0x18e4   : > { %v2246_v45 = vmul.f32 %v2245_v39, %v2241_v41 }
0x18e6   : > { %v2251_v3 = vadd.f32 %v2250_v44, %v2246_v45 }
0x18e8   : > { %v2252_v46 = vpack.c.bf16 %v2251_v3, %v2251_v3 }
0x18ea   : > { %2834 = vmatmul.mubr.msk.bf16.vlgmr.msra.gmra.mrb[40].mxu0 %vm394_vm1, %v2252_v46 }
0x19bd   : > { %v2308_v56 = vpop.f32.mrb[40].mxu0 }
0x19be   : > { %v2309_v57 = vadd.f32 %v2606_v30, %v2308_v56  ;;  %v2835_v58 = vpop.f32.mrb[41].mxu0 }
0x19bf   : > { %v2311_v59 = vpop.f32.mrb[42].mxu0 }
0x19c0   : > { %v2315_v60 = vmul.f32 0.044715, %v2309_v57  ;;  %v2836_v61 = vpop.f32.mrb[43].mxu0  ;;  %v2314_v4 = vmul.f32 0.5, %v2309_v57 }
0x19c2   : > { %v2316_v62 = vmul.f32 %v2315_v60, %v2309_v57 }
0x19c4   : > { %v2317_v63 = vmul.f32 %v2316_v62, %v2309_v57 }
0x19c6   : > { %v2318_v0 = vadd.f32 %v2317_v63, %v2309_v57 }
0x19c8   : > { %v2319_v13 = vmul.f32 0.7978846, %v2318_v0 }
0x19ca   : > { %2980 = vtanh.f32 %v2319_v13 }
0x19d4   : > { %v2981_v2 = vpop.eup %2980 }
0x19d5   : > { %v2321_v54 = vadd.f32 1.0, %v2981_v2 }
0x19d7   : > { %v2322_v1 = vmul.f32 %v2321_v54, %v2314_v4 }
0x19d9   : > { %v2323_v5 = vpack.c.bf16 %v2322_v1, %v2322_v1 }
0x19db   : > { %2854 = vmatmul.mubr.bf16.vlgmr.msra.gmra.mrb[20].mxu1 %v2323_v5 }
0x1aae   : > { %v2410_v8 = vpop.f32.mrb[20].mxu1 }
0x1aaf   : > { %v2411_v7 = vadd.f32 %v2410_v8, %v2327_v6  ;;  %v2855_v9 = vpop.f32.mrb[21].mxu1 }
0x1ab0   : > { %v2413_v10 = vpop.f32.mrb[22].mxu1 }
0x1ab1   : > { %v2856_v12 = vpop.f32.mrb[23].mxu1  ;;  %v2416_v14 = vadd.f32 %v2411_v7, %v2251_v3 }
0x1ab3   : > { %v2417_v15 = vsel %vm394_vm1, %v2416_v14, 0.0 }
0x1ab4   : > { %2418 = vadd.xlane.f32.xlu0 %v2417_v15 }
0x1b41   : > { %v2419_v16 = vpop.xlane.xlu0 %2418 }
0x1b42   : > { %v2420_v17 = vmul.f32 0.03125, %v2419_v16 }
0x1b44   : > { %v2421_v11 = vsub.f32 %v2416_v14, %v2420_v17 }
0x1b46   : > { %v2422_v19 = vmul.f32 %v2421_v11, %v2421_v11 }
0x1b48   : > { %v2423_v21 = vsel %vm394_vm1, %v2422_v19, 0.0 }
0x1b49   : > { %2424 = vadd.xlane.f32.xlu0 %v2423_v21 }
0x1bd6   : > { %v2425_v22 = vpop.xlane.xlu0 %2424 }
0x1bd7   : > { %v2426_v20 = vmul.f32 0.03125, %v2425_v22 }
0x1bd9   : > { %v2427_v23 = vadd.f32 1e-12, %v2426_v20 }
0x1bdb   : > { %2982 = vrsqrt.f32 %v2427_v23 }
0x1be5   : > { %v2983_v25 = vpop.eup %2982 }
0x1be6   : > { %v2429_v26 = vmul.f32 %v2983_v25, %v2421_v11 }
0x1be8   : > { %v2434_v31 = vmul.f32 %v2433_v24, %v2429_v26 }
0x1bea   : > { %v2439_v32 = vadd.f32 %v2438_v27, %v2434_v31 }
0x1bec   : > { %2441 = vst.msk [vmem:[%s333_s16] sm:$0x1] %vm2440_vm5, %v2439_v32 }
0x1bed   : > { %2997 = shalt.err (!%p2994_p3)
}
0x1bee   : > { %s2998_s21 = scalar_lea.hbm %s3564_s26, 16  ;;  %s3002_s16 = scalar_lea.hbm %s3615_s9, 32 }
0x1bef   : > { %p2999_p4 = scmp.ne.s32.totalorder %s3564_s26, %s2998_s21  ;;  %p3003_p9 = scmp.lt.u32.totalorder %s3564_s26, %s3615_s9 }
0x1bf0   : > { %p3004_p10 = scmp.lt.u32.totalorder %s3002_s16, %s2998_s21  ;;  %p3006_p12 = scmp.lt.u32.totalorder %s2998_s21, %s3564_s26 }
0x1bf1   : > { %p3000_p7 = pnand %p2999_p4, %p3153_p5 }
0x1bf2   : > { %p3005_p11 = por %p3004_p10, %p3003_p9 }
0x1bf3   : > { %p3001_p8 = pneg %p3000_p7 }
0x1bf4   : > { %p3007_p13 = por %p3006_p12, %p3005_p11 }
0x1bf6   : > { %p3008_p0 = pnand %p3007_p13, %p3001_p8 }
0x1bf8   : > { %3011 = shalt.err (!%p3008_p0)
}
0x1bf9   : > { %2857 = dma.vmem_to_hbm [thread:$0]  (%p3153_p5), %s3566_s27, 16, %s3564_s26, %s2443_s28  }
0x1bfa PF: > { %p2863_p1 = scmp.ge.s32.totalorder %s3046_s12, 2  ;;  %s2467_s14 = sand.u32 1, %s3034_s30  }
0x1bfb   : > { %s2468_s13 = scalar_lea.sflag [#allocation3], %s2467_s14 }
0x1bfc   : > { %p2860_p2 = pnand %p2863_p1, %p3157_p6 }
0x1bfe   : > { %3029 = dma.done.wait (!%p2860_p2), %s2468_s13, 16  }
0x1bff   : > { %3031 = vsyncadd (!%p2860_p2), %s2468_s13, 4294967280  ;;  %p19_p3 = scmp.ge.s32.totalorder %s3140_s15, 4   ;;  %s3638_s30 = smov %s3038_s10 }
0x1c00   : > { %s3639_s10 = smov %s3042_s11  ;;  %s3640_s11 = smov %s3151_s18 }
0x1c01   : > { %s3641_s12 = smov %s3140_s15  ;;  %21 = sbr.rel (!%p19_p3) target bundleno = 3 (0x3), region = 101 }
0x1c08   :  { %2472 = vsyncpa [#allocation3], 1 }
0x1c09   :  { %2474 = vsyncpa [#allocation3 + $0x1], 1 }

</bundles_post_ra>
